<compile_context>
chip_gen: v5e
topology: v5e:2x2
jax: 0.10.0
libtpu: 0.0.40
codegen_flags: <defaults>
</compile_context>

<pallas_src>
import functools

import jax
import jax.numpy as jnp
from jax.experimental import pallas as pl
from jax.experimental.pallas import tpu as pltpu


# ------------------------------ fused kernel ------------------------------- #

def _fri_net_kernel(x_ref, q_ref, stem_ref, hrow_ref, hcol_ref, line_ref, occ_ref,
                    *, C, hidden, R, Lp, Nq, B_blk):
    # x_ref    : (B_blk, C, HW)            flattened NCHW image (pixels on lanes)
    # q_ref    : (B_blk, 2, Nq)            query x / y rows (queries on lanes)
    # stem_ref : (hidden, C+1)             [:, c] = conv weight col, [:, C] = bias
    # hrow_ref : (hidden+1, 3*R*Lp)        folded head, row layout (r, k, l) on lanes
    # hcol_ref : (3*R*Lp, hidden+1)        folded head, col layout (k, r, l) on sublanes
    # line_ref : (B_blk, 1, 3*R*Lp)        line params, single lane-dense row / sample
    # occ_ref  : (B_blk, R, Nq)            occupancy, lane-dense in Nq
    RL = R * Lp

    # ---- hoisted parameter loads (shared by every sample in the block) ----
    w_row = hrow_ref[0:hidden, :]               # [hidden, 3*R*Lp]
    b_row = hrow_ref[hidden:hidden + 1, :]      # [1, 3*R*Lp]
    w_col = hcol_ref[:, 0:hidden]               # [3*R*Lp, hidden]
    b_col = hcol_ref[:, hidden:hidden + 1]      # [3*R*Lp, 1]
    b1 = stem_ref[:, C:C + 1]                   # [hidden, 1]

    # identity mask used to turn the pooled column into a pooled row
    # (mul + sublane reduce; avoids an in-kernel transpose), hoisted once per step
    ri = jax.lax.broadcasted_iota(jnp.int32, (hidden, hidden), 0)
    ci = jax.lax.broadcasted_iota(jnp.int32, (hidden, hidden), 1)
    eye = jnp.where(ri == ci, 1.0, 0.0)         # [hidden, hidden]

    for b in range(B_blk):                      # static unroll, B_blk in {1, 2}
        x_b = x_ref[b]                          # [C, HW]

        # ---- encoder stem: 1x1 conv (C FMAs) + ReLU + global mean pool ----
        acc = stem_ref[:, 0:1] * x_b[0:1, :]
        for c in range(1, C):
            acc = acc + stem_ref[:, c:c + 1] * x_b[c:c + 1, :]
        feat = jnp.maximum(acc + b1, 0.0)                           # [hidden, HW]
        pooled_c = jnp.mean(feat, axis=1, keepdims=True)            # [hidden, 1]
        pooled_r = jnp.sum(eye * pooled_c, axis=0, keepdims=True)   # [1, hidden]

        # ---- folded (code head o line head): all rooms & lines at once ----
        # row layout (r, k, l) on lanes -> single lane-dense line-parameter store
        abc_row = jnp.sum(w_row * pooled_c, axis=0, keepdims=True) + b_row  # [1, 3*R*Lp]
        line_ref[b] = abc_row
        # column layout (k, r, l) on sublanes -> distance-ready a/b/c columns
        abc_col = jnp.sum(w_col * pooled_r, axis=1, keepdims=True) + b_col  # [3*R*Lp, 1]
        a_col = abc_col[0:RL, :]
        bb_col = abc_col[RL:2 * RL, :]
        c_col = abc_col[2 * RL:3 * RL, :]

        # ---- occupancy: one [R*Lp, Nq] FMA block, per-room min, sigmoid AFTER min ----
        qx = jnp.broadcast_to(q_ref[b, 0:1, :], (RL, Nq))
        qy = jnp.broadcast_to(q_ref[b, 1:2, :], (RL, Nq))
        dist = a_col * qx + bb_col * qy + c_col                     # [R*Lp, Nq]
        for r in range(R):                                          # static, tiny
            occ_r = jnp.min(dist[r * Lp:(r + 1) * Lp, :], axis=0, keepdims=True)
            occ_ref[b, r:r + 1, :] = jax.nn.sigmoid(occ_r)          # lane-dense row store


# ------------------------------ model wrapper ------------------------------ #

def _default_num_blocks(batch):
    """One grid step on single-TC chips (v5e/v6e); two parallel steps on dual-TC v7x."""
    try:
        kind = jax.devices()[0].device_kind.lower()
    except Exception:  # pragma: no cover
        kind = ""
    n_tc = 2 if ("v7" in kind or "7x" in kind) else 1
    return max(1, min(batch, n_tc))


def init_params(key, C, hidden, R, code_dim, L):
    k = jax.random.split(key, 4)
    s = 0.1
    return {
        "w_enc1": jax.random.normal(k[0], (C, hidden), jnp.float32) * s,
        "b_enc1": jnp.zeros((hidden,), jnp.float32),
        "w_enc2": jax.random.normal(k[1], (hidden, R * code_dim), jnp.float32) * s,
        "b_enc2": jnp.zeros((R * code_dim,), jnp.float32),
        "w_line": jax.random.normal(k[2], (code_dim, L * 3), jnp.float32) * s,
        "b_line": jax.random.normal(k[3], (L * 3,), jnp.float32) * s,
    }


def fri_net_forward(params, samples, queries, *, R, code_dim, L, hidden, num_blocks=None):
    B, C, H, W = samples.shape
    Nq = queries.shape[1]
    HW = H * W
    cd = code_dim
    Lp = ((L + 7) // 8) * 8                       # pad #lines to a multiple of 8
    hi = jax.lax.Precision.HIGHEST

    if num_blocks is None:
        num_blocks = _default_num_blocks(B)
    B_blk = -(-B // num_blocks)                   # cdiv
    B_pad = num_blocks * B_blk

    # ---- input re-layout (tiny XLA glue) ----
    x_t = samples.reshape(B, C, HW)               # NCHW -> [B, C, H*W]
    q_t = jnp.transpose(queries, (0, 2, 1))       # [B, 2, Nq]
    if B_pad != B:
        x_t = jnp.pad(x_t, ((0, B_pad - B), (0, 0), (0, 0)))
        q_t = jnp.pad(q_t, ((0, B_pad - B), (0, 0), (0, 0)))

    # ---- packed stem params: [hidden, C+1] ----
    stem_pack = jnp.concatenate(
        [params["w_enc1"].T, params["b_enc1"][:, None]], axis=1)

    # ---- fold code head + line head into effective affine maps of pooled ----
    # abc[r, l, k] = sum_h pooled[h] * w_eff[h, r, l, k] + b_eff[r, l, k]   (exact)
    w2 = params["w_enc2"].reshape(hidden, R, cd)
    b2 = params["b_enc2"].reshape(R, cd)
    wl = params["w_line"].reshape(cd, L, 3)
    bl = params["b_line"].reshape(L, 3)
    w_eff = jnp.einsum("hrd,dlk->hrlk", w2, wl, precision=hi)         # [h, r, l, k]
    b_eff = jnp.einsum("rd,dlk->rlk", b2, wl, precision=hi) + bl[None, :, :]
    # pad lines L -> Lp with a = b = 0, c = +1e9 so padded lines never win the min
    if Lp != L:
        w_eff = jnp.pad(w_eff, ((0, 0), (0, 0), (0, Lp - L), (0, 0)))
        pad_b = jnp.zeros((R, Lp - L, 3), jnp.float32).at[:, :, 2].set(1e9)
        b_eff = jnp.concatenate([b_eff, pad_b], axis=1)
    # row pack (line-param output layout): lanes ordered (r, k, l)
    w_rowp = jnp.transpose(w_eff, (0, 1, 3, 2)).reshape(hidden, 3 * R * Lp)
    b_rowp = jnp.transpose(b_eff, (0, 2, 1)).reshape(1, 3 * R * Lp)
    head_row = jnp.concatenate([w_rowp, b_rowp], axis=0)              # [hidden+1, 3*R*Lp]
    # column pack (distance layout): sublanes ordered (k, r, l)
    w_colp = jnp.transpose(w_eff, (3, 1, 2, 0)).reshape(3 * R * Lp, hidden)
    b_colp = jnp.transpose(b_eff, (2, 0, 1)).reshape(3 * R * Lp, 1)
    head_col = jnp.concatenate([w_colp, b_colp], axis=1)              # [3*R*Lp, hidden+1]

    kernel = functools.partial(
        _fri_net_kernel, C=C, hidden=hidden, R=R, Lp=Lp, Nq=Nq, B_blk=B_blk)
    line_flat, occupancy = pl.pallas_call(
        kernel,
        out_shape=(
            jax.ShapeDtypeStruct((B_pad, 1, 3 * R * Lp), jnp.float32),
            jax.ShapeDtypeStruct((B_pad, R, Nq), jnp.float32),
        ),
        grid=(num_blocks,),
        in_specs=[
            pl.BlockSpec((B_blk, C, HW), lambda i: (i, 0, 0)),
            pl.BlockSpec((B_blk, 2, Nq), lambda i: (i, 0, 0)),
            pl.BlockSpec((hidden, C + 1), lambda i: (0, 0)),
            pl.BlockSpec((hidden + 1, 3 * R * Lp), lambda i: (0, 0)),
            pl.BlockSpec((3 * R * Lp, hidden + 1), lambda i: (0, 0)),
        ],
        out_specs=[
            pl.BlockSpec((B_blk, 1, 3 * R * Lp), lambda i: (i, 0, 0)),
            pl.BlockSpec((B_blk, R, Nq), lambda i: (i, 0, 0)),
        ],
        compiler_params=pltpu.CompilerParams(dimension_semantics=("parallel",)),
    )(x_t, q_t, stem_pack, head_row, head_col)

    # (B, 1, 3*R*Lp) row ordered (r, k, l) -> canonical [B, R, L, 3] (tiny XLA glue)
    line_param = line_flat[:B].reshape(B, R, 3, Lp)[..., :L]
    line_param = jnp.transpose(line_param, (0, 1, 3, 2))
    return line_param, occupancy[:B]


# ------------------------- pure-JAX reference check ------------------------ #

def _reference_forward(params, samples, queries, *, R, code_dim, L, hidden):
    B, C, H, W = samples.shape
    x = jnp.transpose(samples, (0, 2, 3, 1)).reshape(B, H * W, C)
    feat = jnp.maximum(jnp.einsum("bpc,ch->bph", x, params["w_enc1"]) + params["b_enc1"], 0.0)
    pooled = feat.mean(axis=1)
    codes = (pooled @ params["w_enc2"] + params["b_enc2"]).reshape(B, R, code_dim)
    line = jnp.einsum("brd,dk->brk", codes, params["w_line"]) + params["b_line"]
    line_param = line.reshape(B, R, L, 3)
    a = line_param[..., 0]
    b = line_param[..., 1]
    c = line_param[..., 2]
    qx = queries[..., 0]
    qy = queries[..., 1]
    dist = (a[:, :, :, None] * qx[:, None, None, :]
            + b[:, :, :, None] * qy[:, None, None, :]
            + c[:, :, :, None])
    occ = jax.nn.sigmoid(jnp.min(dist, axis=2))
    return line_param, occ


# ---------------------------------- main ----------------------------------- #

if __name__ == "__main__":
    key = jax.random.PRNGKey(0)
    B, C, H, W = 2, 3, 16, 16
    Nq = 128
    R, code_dim, hidden = 4, 32, 32
    num_horizontal_line, num_vertical_line, num_diagonal_line = 4, 4, 4
    phase = 1
    if phase == 0:
        L = num_horizontal_line + num_vertical_line
    else:
        L = num_horizontal_line + num_vertical_line + num_diagonal_line

    kp, ks, kq = jax.random.split(key, 3)
    params = init_params(kp, C, hidden, R, code_dim, L)
    samples = jax.random.normal(ks, (B, C, H, W), jnp.float32)
    queries = jax.random.uniform(kq, (B, Nq, 2), jnp.float32)

    fwd = jax.jit(functools.partial(
        fri_net_forward, R=R, code_dim=code_dim, L=L, hidden=hidden))
    line_param, occupancy = fwd(params, samples, queries)
    jax.block_until_ready((line_param, occupancy))

    assert line_param.shape == (B, R, L, 3)
    assert occupancy.shape == (B, R, Nq)
    assert bool(jnp.all(jnp.isfinite(line_param)))
    assert bool(jnp.all((occupancy >= 0.0) & (occupancy <= 1.0)))

    ref_line, ref_occ = _reference_forward(
        params, samples, queries, R=R, code_dim=code_dim, L=L, hidden=hidden)
    assert bool(jnp.allclose(line_param, ref_line, atol=1e-4, rtol=1e-4))
    assert bool(jnp.allclose(occupancy, ref_occ, atol=1e-4, rtol=1e-4))

    print("KERNEL_OK")
</pallas_src>

<mosaic_0001>
module attributes {stable_mosaic.version = 11 : i64} {
  func.func @_fri_net_kernel(%arg0: i32, %arg1: memref<2x3x256xf32, #tpu.memory_space<vmem>>, %arg2: memref<2x2x128xf32, #tpu.memory_space<vmem>>, %arg3: memref<32x4xf32, #tpu.memory_space<vmem>>, %arg4: memref<33x192xf32, #tpu.memory_space<vmem>>, %arg5: memref<192x33xf32, #tpu.memory_space<vmem>>, %arg6: memref<2x1x192xf32, #tpu.memory_space<vmem>>, %arg7: memref<2x4x128xf32, #tpu.memory_space<vmem>>) attributes {dimension_semantics = [#tpu.dimension_semantics<parallel>], iteration_bounds = array<i64: 1>, scalar_prefetch = 0 : i64, scratch_operands = 0 : i64, tpu.core_type = #tpu.core_type<tc>, window_params = [{transform_indices = @transform_0, window_bounds = array<i64: 2, 3, 256>}, {transform_indices = @transform_1, window_bounds = array<i64: 2, 2, 128>}, {pipeline_mode = #tpu.pipeline_mode<synchronous>, transform_indices = @transform_2, window_bounds = array<i64: 32, 4>}, {pipeline_mode = #tpu.pipeline_mode<synchronous>, transform_indices = @transform_3, window_bounds = array<i64: 33, 192>}, {pipeline_mode = #tpu.pipeline_mode<synchronous>, transform_indices = @transform_4, window_bounds = array<i64: 192, 33>}, {transform_indices = @transform_5, window_bounds = array<i64: 2, 1, 192>}, {transform_indices = @transform_6, window_bounds = array<i64: 2, 4, 128>}]} {
    %c0 = arith.constant 0 : index
    %c0_0 = arith.constant 0 : index
    %0 = vector.load %arg4[%c0, %c0_0] : memref<33x192xf32, #tpu.memory_space<vmem>>, vector<32x192xf32>
    %c32 = arith.constant 32 : index
    %c0_1 = arith.constant 0 : index
    %1 = vector.load %arg4[%c32, %c0_1] : memref<33x192xf32, #tpu.memory_space<vmem>>, vector<1x192xf32>
    %c0_2 = arith.constant 0 : index
    %c0_3 = arith.constant 0 : index
    %2 = vector.load %arg5[%c0_2, %c0_3] : memref<192x33xf32, #tpu.memory_space<vmem>>, vector<192x32xf32>
    %c0_4 = arith.constant 0 : index
    %c32_5 = arith.constant 32 : index
    %3 = vector.load %arg5[%c0_4, %c32_5] : memref<192x33xf32, #tpu.memory_space<vmem>>, vector<192x1xf32>
    %c0_6 = arith.constant 0 : index
    %c3 = arith.constant 3 : index
    %4 = vector.load %arg3[%c0_6, %c3] : memref<32x4xf32, #tpu.memory_space<vmem>>, vector<32x1xf32>
    %5 = tpu.iota {dimensions = array<i32: 0>} : vector<32x32xi32>
    %6 = tpu.iota {dimensions = array<i32: 1>} : vector<32x32xi32>
    %7 = arith.cmpi eq, %5, %6 : vector<32x32xi32>
    %cst = arith.constant 1.000000e+00 : f32
    %cst_7 = arith.constant 0.000000e+00 : f32
    %8 = vector.broadcast %cst : f32 to vector<32x32xf32>
    %9 = vector.broadcast %cst_7 : f32 to vector<32x32xf32>
    %10 = arith.select %7, %8, %9 : vector<32x32xi1>, vector<32x32xf32>
    %c0_8 = arith.constant 0 : index
    %c0_9 = arith.constant 0 : index
    %c0_10 = arith.constant 0 : index
    %11 = vector.load %arg1[%c0_8, %c0_9, %c0_10] : memref<2x3x256xf32, #tpu.memory_space<vmem>>, vector<1x3x256xf32>
    %12 = vector.shape_cast %11 : vector<1x3x256xf32> to vector<3x256xf32>
    %c0_11 = arith.constant 0 : index
    %c0_12 = arith.constant 0 : index
    %13 = vector.load %arg3[%c0_11, %c0_12] : memref<32x4xf32, #tpu.memory_space<vmem>>, vector<32x1xf32>
    %14 = vector.extract_strided_slice %12 {offsets = [0, 0], sizes = [1, 256], strides = [1, 1]} : vector<3x256xf32> to vector<1x256xf32>
    %15 = vector.broadcast %13 : vector<32x1xf32> to vector<32x256xf32>
    %16 = vector.broadcast %14 : vector<1x256xf32> to vector<32x256xf32>
    %17 = arith.mulf %15, %16 : vector<32x256xf32>
    %c0_13 = arith.constant 0 : index
    %c1 = arith.constant 1 : index
    %18 = vector.load %arg3[%c0_13, %c1] : memref<32x4xf32, #tpu.memory_space<vmem>>, vector<32x1xf32>
    %19 = vector.extract_strided_slice %12 {offsets = [1, 0], sizes = [1, 256], strides = [1, 1]} : vector<3x256xf32> to vector<1x256xf32>
    %20 = vector.broadcast %18 : vector<32x1xf32> to vector<32x256xf32>
    %21 = vector.broadcast %19 : vector<1x256xf32> to vector<32x256xf32>
    %22 = arith.mulf %20, %21 : vector<32x256xf32>
    %23 = arith.addf %17, %22 : vector<32x256xf32>
    %c0_14 = arith.constant 0 : index
    %c2 = arith.constant 2 : index
    %24 = vector.load %arg3[%c0_14, %c2] : memref<32x4xf32, #tpu.memory_space<vmem>>, vector<32x1xf32>
    %25 = vector.extract_strided_slice %12 {offsets = [2, 0], sizes = [1, 256], strides = [1, 1]} : vector<3x256xf32> to vector<1x256xf32>
    %26 = vector.broadcast %24 : vector<32x1xf32> to vector<32x256xf32>
    %27 = vector.broadcast %25 : vector<1x256xf32> to vector<32x256xf32>
    %28 = arith.mulf %26, %27 : vector<32x256xf32>
    %29 = arith.addf %23, %28 : vector<32x256xf32>
    %30 = vector.broadcast %4 : vector<32x1xf32> to vector<32x256xf32>
    %31 = arith.addf %29, %30 : vector<32x256xf32>
    %cst_15 = arith.constant 0.000000e+00 : f32
    %32 = vector.broadcast %cst_15 : f32 to vector<32x256xf32>
    %33 = arith.maximumf %31, %32 : vector<32x256xf32>
    %cst_16 = arith.constant dense<0.000000e+00> : vector<32xf32>
    %34 = vector.multi_reduction <add>, %33, %cst_16 [1] : vector<32x256xf32> to vector<32xf32>
    %35 = vector.shape_cast %34 : vector<32xf32> to vector<32x1xf32>
    %cst_17 = arith.constant 2.560000e+02 : f32
    %36 = vector.broadcast %cst_17 : f32 to vector<32x1xf32>
    %37 = arith.divf %35, %36 : vector<32x1xf32>
    %38 = vector.broadcast %37 : vector<32x1xf32> to vector<32x32xf32>
    %39 = arith.mulf %10, %38 : vector<32x32xf32>
    %cst_18 = arith.constant dense<0.000000e+00> : vector<32xf32>
    %40 = vector.multi_reduction <add>, %39, %cst_18 [0] : vector<32x32xf32> to vector<32xf32>
    %41 = vector.shape_cast %40 : vector<32xf32> to vector<1x32xf32>
    %42 = vector.broadcast %37 : vector<32x1xf32> to vector<32x192xf32>
    %43 = arith.mulf %0, %42 : vector<32x192xf32>
    %cst_19 = arith.constant dense<0.000000e+00> : vector<192xf32>
    %44 = vector.multi_reduction <add>, %43, %cst_19 [0] : vector<32x192xf32> to vector<192xf32>
    %45 = vector.shape_cast %44 : vector<192xf32> to vector<1x192xf32>
    %46 = arith.addf %45, %1 : vector<1x192xf32>
    %c0_20 = arith.constant 0 : index
    %c0_21 = arith.constant 0 : index
    %c0_22 = arith.constant 0 : index
    %47 = vector.load %arg6[%c0_20, %c0_21, %c0_22] : memref<2x1x192xf32, #tpu.memory_space<vmem>>, vector<1x1x192xf32>
    %48 = vector.shape_cast %47 : vector<1x1x192xf32> to vector<1x192xf32>
    %49 = vector.shape_cast %46 : vector<1x192xf32> to vector<1x1x192xf32>
    tpu.vector_store %arg6[%c0_20, %c0_21, %c0_22], %49 {strides = array<i32>} : memref<2x1x192xf32, #tpu.memory_space<vmem>>, vector<1x1x192xf32>,
    %50 = vector.broadcast %41 : vector<1x32xf32> to vector<192x32xf32>
    %51 = arith.mulf %2, %50 : vector<192x32xf32>
    %cst_23 = arith.constant dense<0.000000e+00> : vector<192xf32>
    %52 = vector.multi_reduction <add>, %51, %cst_23 [1] : vector<192x32xf32> to vector<192xf32>
    %53 = vector.shape_cast %52 : vector<192xf32> to vector<192x1xf32>
    %54 = arith.addf %53, %3 : vector<192x1xf32>
    %55 = vector.extract_strided_slice %54 {offsets = [0, 0], sizes = [64, 1], strides = [1, 1]} : vector<192x1xf32> to vector<64x1xf32>
    %56 = vector.extract_strided_slice %54 {offsets = [64, 0], sizes = [64, 1], strides = [1, 1]} : vector<192x1xf32> to vector<64x1xf32>
    %57 = vector.extract_strided_slice %54 {offsets = [128, 0], sizes = [64, 1], strides = [1, 1]} : vector<192x1xf32> to vector<64x1xf32>
    %c0_24 = arith.constant 0 : index
    %c0_25 = arith.constant 0 : index
    %c0_26 = arith.constant 0 : index
    %58 = vector.load %arg2[%c0_24, %c0_25, %c0_26] : memref<2x2x128xf32, #tpu.memory_space<vmem>>, vector<1x1x128xf32>
    %59 = vector.shape_cast %58 : vector<1x1x128xf32> to vector<1x128xf32>
    %60 = vector.shape_cast %59 : vector<1x128xf32> to vector<1x128xf32>
    %61 = vector.broadcast %60 : vector<1x128xf32> to vector<64x128xf32>
    %c0_27 = arith.constant 0 : index
    %c1_28 = arith.constant 1 : index
    %c0_29 = arith.constant 0 : index
    %62 = vector.load %arg2[%c0_27, %c1_28, %c0_29] : memref<2x2x128xf32, #tpu.memory_space<vmem>>, vector<1x1x128xf32>
    %63 = vector.shape_cast %62 : vector<1x1x128xf32> to vector<1x128xf32>
    %64 = vector.shape_cast %63 : vector<1x128xf32> to vector<1x128xf32>
    %65 = vector.broadcast %64 : vector<1x128xf32> to vector<64x128xf32>
    %66 = vector.broadcast %55 : vector<64x1xf32> to vector<64x128xf32>
    %67 = arith.mulf %66, %61 : vector<64x128xf32>
    %68 = vector.broadcast %56 : vector<64x1xf32> to vector<64x128xf32>
    %69 = arith.mulf %68, %65 : vector<64x128xf32>
    %70 = arith.addf %67, %69 : vector<64x128xf32>
    %71 = vector.broadcast %57 : vector<64x1xf32> to vector<64x128xf32>
    %72 = arith.addf %70, %71 : vector<64x128xf32>
    %73 = vector.extract_strided_slice %72 {offsets = [0, 0], sizes = [16, 128], strides = [1, 1]} : vector<64x128xf32> to vector<16x128xf32>
    %cst_30 = arith.constant dense<0x7F800000> : vector<128xf32>
    %74 = vector.multi_reduction <minimumf>, %73, %cst_30 [0] : vector<16x128xf32> to vector<128xf32>
    %75 = vector.shape_cast %74 : vector<128xf32> to vector<1x128xf32>
    %76 = arith.negf %75 : vector<1x128xf32>
    %77 = math.exp %76 : vector<1x128xf32>
    %cst_31 = arith.constant 1.000000e+00 : f32
    %78 = vector.broadcast %cst_31 : f32 to vector<1x128xf32>
    %79 = arith.addf %78, %77 : vector<1x128xf32>
    %80 = arith.divf %78, %79 : vector<1x128xf32>
    %c0_32 = arith.constant 0 : index
    %c0_33 = arith.constant 0 : index
    %c0_34 = arith.constant 0 : index
    %81 = vector.load %arg7[%c0_32, %c0_33, %c0_34] : memref<2x4x128xf32, #tpu.memory_space<vmem>>, vector<1x1x128xf32>
    %82 = vector.shape_cast %81 : vector<1x1x128xf32> to vector<1x128xf32>
    %83 = vector.shape_cast %80 : vector<1x128xf32> to vector<1x1x128xf32>
    tpu.vector_store %arg7[%c0_32, %c0_33, %c0_34], %83 {strides = array<i32>} : memref<2x4x128xf32, #tpu.memory_space<vmem>>, vector<1x1x128xf32>,
    %84 = vector.extract_strided_slice %72 {offsets = [16, 0], sizes = [16, 128], strides = [1, 1]} : vector<64x128xf32> to vector<16x128xf32>
    %cst_35 = arith.constant dense<0x7F800000> : vector<128xf32>
    %85 = vector.multi_reduction <minimumf>, %84, %cst_35 [0] : vector<16x128xf32> to vector<128xf32>
    %86 = vector.shape_cast %85 : vector<128xf32> to vector<1x128xf32>
    %87 = arith.negf %86 : vector<1x128xf32>
    %88 = math.exp %87 : vector<1x128xf32>
    %cst_36 = arith.constant 1.000000e+00 : f32
    %89 = vector.broadcast %cst_36 : f32 to vector<1x128xf32>
    %90 = arith.addf %89, %88 : vector<1x128xf32>
    %91 = arith.divf %89, %90 : vector<1x128xf32>
    %c0_37 = arith.constant 0 : index
    %c1_38 = arith.constant 1 : index
    %c0_39 = arith.constant 0 : index
    %92 = vector.load %arg7[%c0_37, %c1_38, %c0_39] : memref<2x4x128xf32, #tpu.memory_space<vmem>>, vector<1x1x128xf32>
    %93 = vector.shape_cast %92 : vector<1x1x128xf32> to vector<1x128xf32>
    %94 = vector.shape_cast %91 : vector<1x128xf32> to vector<1x1x128xf32>
    tpu.vector_store %arg7[%c0_37, %c1_38, %c0_39], %94 {strides = array<i32>} : memref<2x4x128xf32, #tpu.memory_space<vmem>>, vector<1x1x128xf32>,
    %95 = vector.extract_strided_slice %72 {offsets = [32, 0], sizes = [16, 128], strides = [1, 1]} : vector<64x128xf32> to vector<16x128xf32>
    %cst_40 = arith.constant dense<0x7F800000> : vector<128xf32>
    %96 = vector.multi_reduction <minimumf>, %95, %cst_40 [0] : vector<16x128xf32> to vector<128xf32>
    %97 = vector.shape_cast %96 : vector<128xf32> to vector<1x128xf32>
    %98 = arith.negf %97 : vector<1x128xf32>
    %99 = math.exp %98 : vector<1x128xf32>
    %cst_41 = arith.constant 1.000000e+00 : f32
    %100 = vector.broadcast %cst_41 : f32 to vector<1x128xf32>
    %101 = arith.addf %100, %99 : vector<1x128xf32>
    %102 = arith.divf %100, %101 : vector<1x128xf32>
    %c0_42 = arith.constant 0 : index
    %c2_43 = arith.constant 2 : index
    %c0_44 = arith.constant 0 : index
    %103 = vector.load %arg7[%c0_42, %c2_43, %c0_44] : memref<2x4x128xf32, #tpu.memory_space<vmem>>, vector<1x1x128xf32>
    %104 = vector.shape_cast %103 : vector<1x1x128xf32> to vector<1x128xf32>
    %105 = vector.shape_cast %102 : vector<1x128xf32> to vector<1x1x128xf32>
    tpu.vector_store %arg7[%c0_42, %c2_43, %c0_44], %105 {strides = array<i32>} : memref<2x4x128xf32, #tpu.memory_space<vmem>>, vector<1x1x128xf32>,
    %106 = vector.extract_strided_slice %72 {offsets = [48, 0], sizes = [16, 128], strides = [1, 1]} : vector<64x128xf32> to vector<16x128xf32>
    %cst_45 = arith.constant dense<0x7F800000> : vector<128xf32>
    %107 = vector.multi_reduction <minimumf>, %106, %cst_45 [0] : vector<16x128xf32> to vector<128xf32>
    %108 = vector.shape_cast %107 : vector<128xf32> to vector<1x128xf32>
    %109 = arith.negf %108 : vector<1x128xf32>
    %110 = math.exp %109 : vector<1x128xf32>
    %cst_46 = arith.constant 1.000000e+00 : f32
    %111 = vector.broadcast %cst_46 : f32 to vector<1x128xf32>
    %112 = arith.addf %111, %110 : vector<1x128xf32>
    %113 = arith.divf %111, %112 : vector<1x128xf32>
    %c0_47 = arith.constant 0 : index
    %c3_48 = arith.constant 3 : index
    %c0_49 = arith.constant 0 : index
    %114 = vector.load %arg7[%c0_47, %c3_48, %c0_49] : memref<2x4x128xf32, #tpu.memory_space<vmem>>, vector<1x1x128xf32>
    %115 = vector.shape_cast %114 : vector<1x1x128xf32> to vector<1x128xf32>
    %116 = vector.shape_cast %113 : vector<1x128xf32> to vector<1x1x128xf32>
    tpu.vector_store %arg7[%c0_47, %c3_48, %c0_49], %116 {strides = array<i32>} : memref<2x4x128xf32, #tpu.memory_space<vmem>>, vector<1x1x128xf32>,
    %c1_50 = arith.constant 1 : index
    %c0_51 = arith.constant 0 : index
    %c0_52 = arith.constant 0 : index
    %117 = vector.load %arg1[%c1_50, %c0_51, %c0_52] : memref<2x3x256xf32, #tpu.memory_space<vmem>>, vector<1x3x256xf32>
    %118 = vector.shape_cast %117 : vector<1x3x256xf32> to vector<3x256xf32>
    %c0_53 = arith.constant 0 : index
    %c0_54 = arith.constant 0 : index
    %119 = vector.load %arg3[%c0_53, %c0_54] : memref<32x4xf32, #tpu.memory_space<vmem>>, vector<32x1xf32>
    %120 = vector.extract_strided_slice %118 {offsets = [0, 0], sizes = [1, 256], strides = [1, 1]} : vector<3x256xf32> to vector<1x256xf32>
    %121 = vector.broadcast %119 : vector<32x1xf32> to vector<32x256xf32>
    %122 = vector.broadcast %120 : vector<1x256xf32> to vector<32x256xf32>
    %123 = arith.mulf %121, %122 : vector<32x256xf32>
    %c0_55 = arith.constant 0 : index
    %c1_56 = arith.constant 1 : index
    %124 = vector.load %arg3[%c0_55, %c1_56] : memref<32x4xf32, #tpu.memory_space<vmem>>, vector<32x1xf32>
    %125 = vector.extract_strided_slice %118 {offsets = [1, 0], sizes = [1, 256], strides = [1, 1]} : vector<3x256xf32> to vector<1x256xf32>
    %126 = vector.broadcast %124 : vector<32x1xf32> to vector<32x256xf32>
    %127 = vector.broadcast %125 : vector<1x256xf32> to vector<32x256xf32>
    %128 = arith.mulf %126, %127 : vector<32x256xf32>
    %129 = arith.addf %123, %128 : vector<32x256xf32>
    %c0_57 = arith.constant 0 : index
    %c2_58 = arith.constant 2 : index
    %130 = vector.load %arg3[%c0_57, %c2_58] : memref<32x4xf32, #tpu.memory_space<vmem>>, vector<32x1xf32>
    %131 = vector.extract_strided_slice %118 {offsets = [2, 0], sizes = [1, 256], strides = [1, 1]} : vector<3x256xf32> to vector<1x256xf32>
    %132 = vector.broadcast %130 : vector<32x1xf32> to vector<32x256xf32>
    %133 = vector.broadcast %131 : vector<1x256xf32> to vector<32x256xf32>
    %134 = arith.mulf %132, %133 : vector<32x256xf32>
    %135 = arith.addf %129, %134 : vector<32x256xf32>
    %136 = vector.broadcast %4 : vector<32x1xf32> to vector<32x256xf32>
    %137 = arith.addf %135, %136 : vector<32x256xf32>
    %cst_59 = arith.constant 0.000000e+00 : f32
    %138 = vector.broadcast %cst_59 : f32 to vector<32x256xf32>
    %139 = arith.maximumf %137, %138 : vector<32x256xf32>
    %cst_60 = arith.constant dense<0.000000e+00> : vector<32xf32>
    %140 = vector.multi_reduction <add>, %139, %cst_60 [1] : vector<32x256xf32> to vector<32xf32>
    %141 = vector.shape_cast %140 : vector<32xf32> to vector<32x1xf32>
    %cst_61 = arith.constant 2.560000e+02 : f32
    %142 = vector.broadcast %cst_61 : f32 to vector<32x1xf32>
    %143 = arith.divf %141, %142 : vector<32x1xf32>
    %144 = vector.broadcast %143 : vector<32x1xf32> to vector<32x32xf32>
    %145 = arith.mulf %10, %144 : vector<32x32xf32>
    %cst_62 = arith.constant dense<0.000000e+00> : vector<32xf32>
    %146 = vector.multi_reduction <add>, %145, %cst_62 [0] : vector<32x32xf32> to vector<32xf32>
    %147 = vector.shape_cast %146 : vector<32xf32> to vector<1x32xf32>
    %148 = vector.broadcast %143 : vector<32x1xf32> to vector<32x192xf32>
    %149 = arith.mulf %0, %148 : vector<32x192xf32>
    %cst_63 = arith.constant dense<0.000000e+00> : vector<192xf32>
    %150 = vector.multi_reduction <add>, %149, %cst_63 [0] : vector<32x192xf32> to vector<192xf32>
    %151 = vector.shape_cast %150 : vector<192xf32> to vector<1x192xf32>
    %152 = arith.addf %151, %1 : vector<1x192xf32>
    %c1_64 = arith.constant 1 : index
    %c0_65 = arith.constant 0 : index
    %c0_66 = arith.constant 0 : index
    %153 = vector.load %arg6[%c1_64, %c0_65, %c0_66] : memref<2x1x192xf32, #tpu.memory_space<vmem>>, vector<1x1x192xf32>
    %154 = vector.shape_cast %153 : vector<1x1x192xf32> to vector<1x192xf32>
    %155 = vector.shape_cast %152 : vector<1x192xf32> to vector<1x1x192xf32>
    tpu.vector_store %arg6[%c1_64, %c0_65, %c0_66], %155 {strides = array<i32>} : memref<2x1x192xf32, #tpu.memory_space<vmem>>, vector<1x1x192xf32>,
    %156 = vector.broadcast %147 : vector<1x32xf32> to vector<192x32xf32>
    %157 = arith.mulf %2, %156 : vector<192x32xf32>
    %cst_67 = arith.constant dense<0.000000e+00> : vector<192xf32>
    %158 = vector.multi_reduction <add>, %157, %cst_67 [1] : vector<192x32xf32> to vector<192xf32>
    %159 = vector.shape_cast %158 : vector<192xf32> to vector<192x1xf32>
    %160 = arith.addf %159, %3 : vector<192x1xf32>
    %161 = vector.extract_strided_slice %160 {offsets = [0, 0], sizes = [64, 1], strides = [1, 1]} : vector<192x1xf32> to vector<64x1xf32>
    %162 = vector.extract_strided_slice %160 {offsets = [64, 0], sizes = [64, 1], strides = [1, 1]} : vector<192x1xf32> to vector<64x1xf32>
    %163 = vector.extract_strided_slice %160 {offsets = [128, 0], sizes = [64, 1], strides = [1, 1]} : vector<192x1xf32> to vector<64x1xf32>
    %c1_68 = arith.constant 1 : index
    %c0_69 = arith.constant 0 : index
    %c0_70 = arith.constant 0 : index
    %164 = vector.load %arg2[%c1_68, %c0_69, %c0_70] : memref<2x2x128xf32, #tpu.memory_space<vmem>>, vector<1x1x128xf32>
    %165 = vector.shape_cast %164 : vector<1x1x128xf32> to vector<1x128xf32>
    %166 = vector.shape_cast %165 : vector<1x128xf32> to vector<1x128xf32>
    %167 = vector.broadcast %166 : vector<1x128xf32> to vector<64x128xf32>
    %c1_71 = arith.constant 1 : index
    %c1_72 = arith.constant 1 : index
    %c0_73 = arith.constant 0 : index
    %168 = vector.load %arg2[%c1_71, %c1_72, %c0_73] : memref<2x2x128xf32, #tpu.memory_space<vmem>>, vector<1x1x128xf32>
    %169 = vector.shape_cast %168 : vector<1x1x128xf32> to vector<1x128xf32>
    %170 = vector.shape_cast %169 : vector<1x128xf32> to vector<1x128xf32>
    %171 = vector.broadcast %170 : vector<1x128xf32> to vector<64x128xf32>
    %172 = vector.broadcast %161 : vector<64x1xf32> to vector<64x128xf32>
    %173 = arith.mulf %172, %167 : vector<64x128xf32>
    %174 = vector.broadcast %162 : vector<64x1xf32> to vector<64x128xf32>
    %175 = arith.mulf %174, %171 : vector<64x128xf32>
    %176 = arith.addf %173, %175 : vector<64x128xf32>
    %177 = vector.broadcast %163 : vector<64x1xf32> to vector<64x128xf32>
    %178 = arith.addf %176, %177 : vector<64x128xf32>
    %179 = vector.extract_strided_slice %178 {offsets = [0, 0], sizes = [16, 128], strides = [1, 1]} : vector<64x128xf32> to vector<16x128xf32>
    %cst_74 = arith.constant dense<0x7F800000> : vector<128xf32>
    %180 = vector.multi_reduction <minimumf>, %179, %cst_74 [0] : vector<16x128xf32> to vector<128xf32>
    %181 = vector.shape_cast %180 : vector<128xf32> to vector<1x128xf32>
    %182 = arith.negf %181 : vector<1x128xf32>
    %183 = math.exp %182 : vector<1x128xf32>
    %cst_75 = arith.constant 1.000000e+00 : f32
    %184 = vector.broadcast %cst_75 : f32 to vector<1x128xf32>
    %185 = arith.addf %184, %183 : vector<1x128xf32>
    %186 = arith.divf %184, %185 : vector<1x128xf32>
    %c1_76 = arith.constant 1 : index
    %c0_77 = arith.constant 0 : index
    %c0_78 = arith.constant 0 : index
    %187 = vector.load %arg7[%c1_76, %c0_77, %c0_78] : memref<2x4x128xf32, #tpu.memory_space<vmem>>, vector<1x1x128xf32>
    %188 = vector.shape_cast %187 : vector<1x1x128xf32> to vector<1x128xf32>
    %189 = vector.shape_cast %186 : vector<1x128xf32> to vector<1x1x128xf32>
    tpu.vector_store %arg7[%c1_76, %c0_77, %c0_78], %189 {strides = array<i32>} : memref<2x4x128xf32, #tpu.memory_space<vmem>>, vector<1x1x128xf32>,
    %190 = vector.extract_strided_slice %178 {offsets = [16, 0], sizes = [16, 128], strides = [1, 1]} : vector<64x128xf32> to vector<16x128xf32>
    %cst_79 = arith.constant dense<0x7F800000> : vector<128xf32>
    %191 = vector.multi_reduction <minimumf>, %190, %cst_79 [0] : vector<16x128xf32> to vector<128xf32>
    %192 = vector.shape_cast %191 : vector<128xf32> to vector<1x128xf32>
    %193 = arith.negf %192 : vector<1x128xf32>
    %194 = math.exp %193 : vector<1x128xf32>
    %cst_80 = arith.constant 1.000000e+00 : f32
    %195 = vector.broadcast %cst_80 : f32 to vector<1x128xf32>
    %196 = arith.addf %195, %194 : vector<1x128xf32>
    %197 = arith.divf %195, %196 : vector<1x128xf32>
    %c1_81 = arith.constant 1 : index
    %c1_82 = arith.constant 1 : index
    %c0_83 = arith.constant 0 : index
    %198 = vector.load %arg7[%c1_81, %c1_82, %c0_83] : memref<2x4x128xf32, #tpu.memory_space<vmem>>, vector<1x1x128xf32>
    %199 = vector.shape_cast %198 : vector<1x1x128xf32> to vector<1x128xf32>
    %200 = vector.shape_cast %197 : vector<1x128xf32> to vector<1x1x128xf32>
    tpu.vector_store %arg7[%c1_81, %c1_82, %c0_83], %200 {strides = array<i32>} : memref<2x4x128xf32, #tpu.memory_space<vmem>>, vector<1x1x128xf32>,
    %201 = vector.extract_strided_slice %178 {offsets = [32, 0], sizes = [16, 128], strides = [1, 1]} : vector<64x128xf32> to vector<16x128xf32>
    %cst_84 = arith.constant dense<0x7F800000> : vector<128xf32>
    %202 = vector.multi_reduction <minimumf>, %201, %cst_84 [0] : vector<16x128xf32> to vector<128xf32>
    %203 = vector.shape_cast %202 : vector<128xf32> to vector<1x128xf32>
    %204 = arith.negf %203 : vector<1x128xf32>
    %205 = math.exp %204 : vector<1x128xf32>
    %cst_85 = arith.constant 1.000000e+00 : f32
    %206 = vector.broadcast %cst_85 : f32 to vector<1x128xf32>
    %207 = arith.addf %206, %205 : vector<1x128xf32>
    %208 = arith.divf %206, %207 : vector<1x128xf32>
    %c1_86 = arith.constant 1 : index
    %c2_87 = arith.constant 2 : index
    %c0_88 = arith.constant 0 : index
    %209 = vector.load %arg7[%c1_86, %c2_87, %c0_88] : memref<2x4x128xf32, #tpu.memory_space<vmem>>, vector<1x1x128xf32>
    %210 = vector.shape_cast %209 : vector<1x1x128xf32> to vector<1x128xf32>
    %211 = vector.shape_cast %208 : vector<1x128xf32> to vector<1x1x128xf32>
    tpu.vector_store %arg7[%c1_86, %c2_87, %c0_88], %211 {strides = array<i32>} : memref<2x4x128xf32, #tpu.memory_space<vmem>>, vector<1x1x128xf32>,
    %212 = vector.extract_strided_slice %178 {offsets = [48, 0], sizes = [16, 128], strides = [1, 1]} : vector<64x128xf32> to vector<16x128xf32>
    %cst_89 = arith.constant dense<0x7F800000> : vector<128xf32>
    %213 = vector.multi_reduction <minimumf>, %212, %cst_89 [0] : vector<16x128xf32> to vector<128xf32>
    %214 = vector.shape_cast %213 : vector<128xf32> to vector<1x128xf32>
    %215 = arith.negf %214 : vector<1x128xf32>
    %216 = math.exp %215 : vector<1x128xf32>
    %cst_90 = arith.constant 1.000000e+00 : f32
    %217 = vector.broadcast %cst_90 : f32 to vector<1x128xf32>
    %218 = arith.addf %217, %216 : vector<1x128xf32>
    %219 = arith.divf %217, %218 : vector<1x128xf32>
    %c1_91 = arith.constant 1 : index
    %c3_92 = arith.constant 3 : index
    %c0_93 = arith.constant 0 : index
    %220 = vector.load %arg7[%c1_91, %c3_92, %c0_93] : memref<2x4x128xf32, #tpu.memory_space<vmem>>, vector<1x1x128xf32>
    %221 = vector.shape_cast %220 : vector<1x1x128xf32> to vector<1x128xf32>
    %222 = vector.shape_cast %219 : vector<1x128xf32> to vector<1x1x128xf32>
    tpu.vector_store %arg7[%c1_91, %c3_92, %c0_93], %222 {strides = array<i32>} : memref<2x4x128xf32, #tpu.memory_space<vmem>>, vector<1x1x128xf32>,
    return
  }
  func.func @transform_0(%arg0: i32) -> (i32, i32, i32) {
    %c0_i32 = arith.constant 0 : i32
    %c0_i32_0 = arith.constant 0 : i32
    %c0_i32_1 = arith.constant 0 : i32
    return %arg0, %c0_i32, %c0_i32_0 : i32, i32, i32
  }
  func.func @transform_1(%arg0: i32) -> (i32, i32, i32) {
    %c0_i32 = arith.constant 0 : i32
    %c0_i32_0 = arith.constant 0 : i32
    %c0_i32_1 = arith.constant 0 : i32
    return %arg0, %c0_i32, %c0_i32_0 : i32, i32, i32
  }
  func.func @transform_2(%arg0: i32) -> (i32, i32) {
    %c0_i32 = arith.constant 0 : i32
    %c0_i32_0 = arith.constant 0 : i32
    %c0_i32_1 = arith.constant 0 : i32
    return %c0_i32, %c0_i32_0 : i32, i32
  }
  func.func @transform_3(%arg0: i32) -> (i32, i32) {
    %c0_i32 = arith.constant 0 : i32
    %c0_i32_0 = arith.constant 0 : i32
    %c0_i32_1 = arith.constant 0 : i32
    return %c0_i32, %c0_i32_0 : i32, i32
  }
  func.func @transform_4(%arg0: i32) -> (i32, i32) {
    %c0_i32 = arith.constant 0 : i32
    %c0_i32_0 = arith.constant 0 : i32
    %c0_i32_1 = arith.constant 0 : i32
    return %c0_i32, %c0_i32_0 : i32, i32
  }
  func.func @transform_5(%arg0: i32) -> (i32, i32, i32) {
    %c0_i32 = arith.constant 0 : i32
    %c0_i32_0 = arith.constant 0 : i32
    %c0_i32_1 = arith.constant 0 : i32
    return %arg0, %c0_i32, %c0_i32_0 : i32, i32, i32
  }
  func.func @transform_6(%arg0: i32) -> (i32, i32, i32) {
    %c0_i32 = arith.constant 0 : i32
    %c0_i32_0 = arith.constant 0 : i32
    %c0_i32_1 = arith.constant 0 : i32
    return %arg0, %c0_i32, %c0_i32_0 : i32, i32, i32
  }
}

</mosaic_0001>

<bundles_post_ra>
// kernel: fri_net_forward.1
= control target key start
LH: loop header
LB: loop body
LE: loop exit
PB: predicated region body
PF: predicated region fallthrough
CT: control target
= control target key end

     0   :  { %v1413_v2 = vmov 1   ;;  %v1414_v3 = vmov 0   ;;  %s2105_s0 = inlined_call_operand.vmem [shape: f32[2,3,256], index: 0, kind: input, shape index: {}]   ;;  %s2106_s1 = inlined_call_operand.vmem [shape: f32[2,2,128], index: 1, kind: input, shape index: {}]   ;;  %s2107_s2 = inlined_call_operand.vmem [shape: f32[32,4], index: 2, kind: input, shape index: {}]   ;;  %s2108_s3 = inlined_call_operand.vmem [shape: f32[33,192], index: 3, kind: input, shape index: {}]   ;;  %s2109_s4 = inlined_call_operand.vmem [shape: f32[192,33], index: 4, kind: input, shape index: {}]   ;;  %s2110_s5 = inlined_call_operand.vmem [shape: f32[2,1,192], index: 5, kind: output, shape index: {0}]   ;;  %s2111_s6 = inlined_call_operand.hbm [shape: f32[2,4,128], index: 6, kind: output, shape index: {1}]  }
   0x1   :  { %v59_v0 = vld [vmem:[%s2107_s2 + $0x10] sm:$0xff]  ;;  %v57_v1 = vld [vmem:[%s2107_s2] sm:$0xff]  ;;  %1332 = vset.pattern.permute.xlu2 %v1413_v2  ;;  %1331 = vset.pattern.permute.xlu1 %v1414_v3 }
   0x2   :  { %1330 = vset.pattern.permute.xlu0 %v1414_v3  ;;  %89 = vperm.xlu1 %1331, %v59_v0  }
   0x3   :  { %12 = vsyncpa [#allocation3], 0  ;;  %113 = vperm.xlu2 %1332, %v57_v1   ;;  %79 = vperm.xlu0 %1330, %v57_v1   ;;  %v1467_v4 = vld [vmem:[%s2107_s2 + $0x18] sm:$0xff]  ;;  %v58_v5 = vld [vmem:[%s2107_s2 + $0x8] sm:$0xff]  ;;  %v1415_v6 = vmov 2   ;;  %v1416_v7 = vmov 3  }
   0x4   :  { %v76_v17 = vld [vmem:[%s2105_s0] sm:$0x77]  ;;  %v1496_v41 = vld [vmem:[%s2105_s0 + $0x8] sm:$0x77]  ;;  %vm247_vm4 = vcmask 261120   ;;  %vm278_vm6 = vcmask 523264  }
   0x5   :  { %v128_v18 = vperm.slane %v76_v17, 1  ;;  %v129_v19 = vperm.slane %v76_v17, 5  ;;  %v98_v21 = vperm.slane %v76_v17, 0  ;;  %v99_v22 = vperm.slane %v76_v17, 4  ;;  %s1293_s30 = sshll.u32 %s2111_s6, 4  ;;  %s1421_s7 = smov 64   ;;  %s1294_s30 = int_to_ptr.hbm [resolvable:$true] %s1293_s30 }
   0x6   :  { %v166_v27 = vperm.slane %v76_v17, 2  ;;  %v167_v28 = vperm.slane %v76_v17, 6  ;;  %v721_v49 = vperm.slane %v1496_v41, 0  ;;  %v722_v56 = vperm.slane %v1496_v41, 4  ;;  %s1422_s0 = smov 4  }
   0x7   :  { %v132_v24 = vperm.slane %v128_v18, 1  ;;  %v133_v25 = vperm.slane %v129_v19, 1  ;;  %v102_v29 = vperm.slane %v98_v21, 0  ;;  %v103_v30 = vperm.slane %v99_v22, 0 }
   0x8   :  { %v170_v35 = vperm.slane %v166_v27, 2  ;;  %v171_v36 = vperm.slane %v167_v28, 2  ;;  %v1504_v63 = vperm.slane %v721_v49, 0  ;;  %vm302_vm7 = vcmask 1040384  }
   0xa   :  { %94 = vperm.xlu1 %1331, %v1467_v4  }
   0xb   :  { %117 = vperm.xlu2 %1332, %v58_v5   ;;  %84 = vperm.xlu0 %1330, %v58_v5  }
  0x12   :  { %1333 = vset.pattern.permute.xlu1 %v1413_v2 }
  0x13   :  { %1334 = vset.pattern.permute.xlu2 %v1415_v6  ;;  %707 = vperm.xlu0 %1330, %v58_v5  }
  0x14   :  { %125 = vperm.xlu1 %1333, %v1467_v4   ;;  %151 = vperm.xlu2 %1334, %v57_v1  }
  0x1b   :  { %1339 = vset.pattern.permute.xlu0 %v1413_v2 }
  0x1c   :  { %1335 = vset.pattern.permute.xlu1 %v1415_v6  ;;  %159 = vperm.xlu2 %1334, %v59_v0  }
  0x1d   :  { %121 = vperm.xlu0 %1339, %v59_v0   ;;  %155 = vperm.xlu1 %1335, %v58_v5  }
  0x24   :  { %1337 = vset.pattern.permute.xlu2 %v1416_v7 }
  0x25   :  { %744 = vperm.xlu0 %1339, %v59_v0   ;;  %1336 = vset.pattern.permute.xlu1 %v1416_v7 }
  0x26   :  { %193 = vperm.xlu2 %1337, %v58_v5   ;;  %189 = vperm.xlu1 %1336, %v57_v1  }
  0x2d   :  { %1343 = vset.pattern.permute.xlu0 %v1415_v6 }
  0x2e   :  { %201 = vperm.xlu2 %1337, %v1467_v4   ;;  %163 = vperm.xlu0 %1343, %v1467_v4  }
  0x2f   :  { %197 = vperm.xlu1 %1336, %v59_v0  }
  0x36   :  { %1338 = vset.pattern.permute.xlu2 %v1414_v3 }
  0x37   :  { %1340 = vset.pattern.permute.xlu1 %v1414_v3  ;;  %702 = vperm.xlu2 %1338, %v57_v1  }
  0x38   :  { %712 = vperm.xlu1 %1340, %v59_v0  }
  0x3f   :  { %717 = vperm.xlu2 %1338, %v1467_v4  }
  0x40   :  { %1341 = vset.pattern.permute.xlu1 %v1413_v2 }
  0x41   :  { %736 = vperm.xlu1 %1341, %v57_v1  }
  0x47   :  { %1342 = vset.pattern.permute.xlu2 %v1413_v2 }
  0x48   :  { %740 = vperm.xlu2 %1342, %v58_v5  }
  0x49   :  { %748 = vperm.xlu1 %1341, %v1467_v4  }
  0x50   :  { %1344 = vset.pattern.permute.xlu2 %v1415_v6 }
  0x51   :  { %1345 = vset.pattern.permute.xlu1 %v1415_v6  ;;  %774 = vperm.xlu2 %1344, %v57_v1   ;;  %v1508_v1 = vperm.slane %v722_v56, 0 }
  0x52   :  { %778 = vperm.xlu1 %1345, %v58_v5  }
  0x59   :  { %782 = vperm.xlu2 %1344, %v59_v0  }
  0x5d   :  { %v114_v8 = vpop.permute.xlu2 %113 }
  0x5e   :  { %v134_v37 = vmul.f32 %v132_v24, %v114_v8  ;;  %v135_v38 = vmul.f32 %v133_v25, %v114_v8 }
  0x65   :  { %v118_v9 = vpop.permute.xlu2 %117 }
  0x66   :  { %v136_v31 = vmul.f32 %v132_v24, %v118_v9  ;;  %v137_v32 = vmul.f32 %v133_v25, %v118_v9 }
  0x6e   :  { %v152_v10 = vpop.permute.xlu2 %151 }
  0x6f   :  { %v172_v52 = vmul.f32 %v170_v35, %v152_v10  ;;  %v173_v53 = vmul.f32 %v171_v36, %v152_v10 }
  0x74   :  { %v1478_v11 = vpop.permute.xlu1 %89 }
  0x75   :  { %v80_v12 = vpop.permute.xlu0 %79  ;;  %v108_v10 = vmul.f32 %v102_v29, %v1478_v11 }
  0x76   :  { %v1480_v13 = vpop.permute.xlu2 %159  ;;  %v104_v39 = vmul.f32 %v102_v29, %v80_v12  ;;  %v105_v40 = vmul.f32 %v103_v30, %v80_v12  ;;  %v109_v12 = vmul.f32 %v103_v30, %v1478_v11 }
  0x77   :  { %v176_v21 = vmul.f32 %v170_v35, %v1480_v13  ;;  %v177_v22 = vmul.f32 %v171_v36, %v1480_v13 }
  0x78   :  { %v142_v54 = vadd.f32 %v134_v37, %v104_v39  ;;  %v143_v55 = vadd.f32 %v135_v38, %v105_v40 }
  0x7a   :  { %v180_v61 = vadd.f32 %v172_v52, %v142_v54  ;;  %v181_v62 = vadd.f32 %v173_v53, %v143_v55  ;;  %v752_v52 = vperm.slane %v1496_v41, 5  ;;  %v789_v53 = vperm.slane %v1496_v41, 2 }
  0x7b   :  { %v790_v54 = vperm.slane %v1496_v41, 6 }
  0x7c   :  { %v1482_v14 = vpop.permute.xlu1 %94 }
  0x7d   :  { %v85_v15 = vpop.permute.xlu0 %84  ;;  %v110_v11 = vmul.f32 %v102_v29, %v1482_v14 }
  0x7e   :  { %v106_v33 = vmul.f32 %v102_v29, %v85_v15  ;;  %v107_v34 = vmul.f32 %v103_v30, %v85_v15 }
  0x80   :  { %v1484_v16 = vpop.permute.xlu2 %193  ;;  %v144_v44 = vadd.f32 %v136_v31, %v106_v33  ;;  %v145_v45 = vadd.f32 %v137_v32, %v107_v34  ;;  %v111_v34 = vmul.f32 %v103_v30, %v1482_v14 }
  0x85   :  { %v1489_v20 = vpop.permute.xlu0 %707 }
  0x86   :  { %v126_v23 = vpop.permute.xlu1 %125 }
  0x87   :  { %v140_v31 = vmul.f32 %v132_v24, %v126_v23  ;;  %v141_v32 = vmul.f32 %v133_v25, %v126_v23 }
  0x88   :  { %v1491_v26 = vpop.permute.xlu2 %201 }
  0x89   :  { %v148_v40 = vadd.f32 %v140_v31, %v110_v11 }
  0x8f   :  { %v122_v42 = vpop.permute.xlu0 %121  ;;  %v156_v43 = vpop.permute.xlu1 %155 }
  0x90   :  { %v174_v46 = vmul.f32 %v170_v35, %v156_v43  ;;  %v175_v47 = vmul.f32 %v171_v36, %v156_v43  ;;  %v138_v2 = vmul.f32 %v132_v24, %v122_v42  ;;  %v139_v3 = vmul.f32 %v133_v25, %v122_v42 }
  0x91   :  { %v1498_v48 = vpop.permute.xlu2 %702  ;;  %v149_v42 = vadd.f32 %v141_v32, %v111_v34  ;;  %v729_v34 = vmul.f32 %v1504_v63, %v1489_v20 }
  0x92   :  { %v182_v50 = vadd.f32 %v174_v46, %v144_v44  ;;  %v183_v51 = vadd.f32 %v175_v47, %v145_v45  ;;  %v146_v27 = vadd.f32 %v138_v2, %v108_v10  ;;  %v147_v28 = vadd.f32 %v139_v3, %v109_v12 }
  0x94   :  { %v206_v57 = vadd.f32 %v1484_v16, %v182_v50  ;;  %v207_v58 = vadd.f32 %v1484_v16, %v183_v51  ;;  %v184_v37 = vadd.f32 %v176_v21, %v146_v27  ;;  %v185_v38 = vadd.f32 %v177_v22, %v147_v28 }
  0x95   :  { %v751_v51 = vperm.slane %v1496_v41, 1 }
  0x96   :  { %v214_v59 = vmax.f32 %v206_v57, 0.0  ;;  %v215_v60 = vmax.f32 %v207_v58, 0.0  ;;  %v756_v57 = vperm.slane %v752_v52, 1  ;;  %v727_v58 = vmul.f32 %v1504_v63, %v1498_v48 }
  0x97   :  { %v1506_v0 = vpop.permute.xlu0 %744  ;;  %v755_v56 = vperm.slane %v751_v51, 1 }
  0x98   :  { %v1510_v5 = vpop.permute.xlu1 %189  ;;  %v223_v6 = vadd.f32 %v215_v60, %v214_v59  ;;  %v728_v59 = vmul.f32 %v1508_v1, %v1498_v48  ;;  %v1540_v60 = vperm.slane %v789_v53, 2 }
  0x99   :  { %v718_v7 = vpop.permute.xlu2 %717  ;;  %v204_v8 = vadd.f32 %v1510_v5, %v180_v61  ;;  %v205_v9 = vadd.f32 %v1510_v5, %v181_v62  ;;  %v1542_v61 = vperm.slane %v790_v54, 2 }
  0x9a   :  { %v1517_v15 = vmul.f32 %v1504_v63, %v718_v7  ;;  %v1520_v17 = vmul.f32 %v1508_v1, %v718_v7  ;;  %224 = vadd.xlane.f32.xlu1 %v223_v6 }
  0x9b   :  { %v212_v18 = vmax.f32 %v204_v8, 0.0  ;;  %v213_v19 = vmax.f32 %v205_v9, 0.0 }
  0x9d   :  { %v220_v33 = vadd.f32 %v213_v19, %v212_v18 }
  0x9f   :  { %221 = vadd.xlane.f32.xlu0 %v220_v33 }
  0xa0   :  { %v164_v39 = vpop.permute.xlu0 %163 }
  0xa1   :  { %v178_v43 = vmul.f32 %v170_v35, %v164_v39  ;;  %v179_v44 = vmul.f32 %v171_v36, %v164_v39  ;;  %v1526_v45 = vpop.permute.xlu1 %197 }
  0xa2   :  { %v208_v13 = vadd.f32 %v1526_v45, %v184_v37  ;;  %v209_v24 = vadd.f32 %v1526_v45, %v185_v38  ;;  %v741_v49 = vpop.permute.xlu2 %740 }
  0xa3   :  { %v186_v23 = vadd.f32 %v178_v43, %v148_v40  ;;  %v187_v25 = vadd.f32 %v179_v44, %v149_v42  ;;  %v759_v33 = vmul.f32 %v755_v56, %v741_v49  ;;  %v760_v11 = vmul.f32 %v756_v57, %v741_v49 }
  0xa4   :  { %v216_v46 = vmax.f32 %v208_v13, 0.0  ;;  %v217_v29 = vmax.f32 %v209_v24, 0.0  ;;  %v762_v42 = vmul.f32 %v756_v57, %v1506_v0 }
  0xa5   :  { %v210_v14 = vadd.f32 %v1491_v26, %v186_v23  ;;  %v211_v30 = vadd.f32 %v1491_v26, %v187_v25  ;;  %v767_v38 = vadd.f32 %v759_v33, %v729_v34  ;;  %v1607_v33 = vld [vmem:[%s2108_s3 + $0x10] sm:$0xff] }
  0xa6   :  { %v226_v47 = vadd.f32 %v217_v29, %v216_v46 }
  0xa7   :  { %v218_v35 = vmax.f32 %v210_v14, 0.0  ;;  %v219_v36 = vmax.f32 %v211_v30, 0.0 }
  0xa8   :  { %227 = vadd.xlane.f32.xlu2 %v226_v47 }
  0xa9   :  { %v229_v55 = vadd.f32 %v219_v36, %v218_v35 }
  0xaa   :  { %v713_v50 = vpop.permute.xlu1 %712 }
  0xab   :  { %v775_v62 = vpop.permute.xlu2 %774  ;;  %v731_v43 = vmul.f32 %v1504_v63, %v713_v50  ;;  %v732_v44 = vmul.f32 %v1508_v1, %v713_v50 }
  0xac   :  { %v795_v41 = vmul.f32 %v1540_v60, %v775_v62  ;;  %v796_v3 = vmul.f32 %v1542_v61, %v775_v62 }
  0xad   :  { %v770_v29 = vadd.f32 %v762_v42, %v732_v44 }
  0xb0   :  { %230 = vadd.xlane.f32.xlu2 %v229_v55 }
  0xb3   :  { %v737_v2 = vpop.permute.xlu1 %736  ;;  %786 = vperm.xlu0 %1343, %v1467_v4   ;;  %v783_v23 = vpop.permute.xlu2 %782 }
  0xb4   :  { %v757_v6 = vmul.f32 %v755_v56, %v737_v2  ;;  %v758_v7 = vmul.f32 %v756_v57, %v737_v2  ;;  %v799_v47 = vmul.f32 %v1540_v60, %v783_v23  ;;  %v800_v14 = vmul.f32 %v1542_v61, %v783_v23 }
  0xb6   :  { %v765_v8 = vadd.f32 %v757_v6, %v727_v58  ;;  %v766_v9 = vadd.f32 %v758_v7, %v728_v59  ;;  %v808_v63 = vadd.f32 %v800_v14, %v770_v29 }
  0xb8   :  { %v803_v10 = vadd.f32 %v795_v41, %v765_v8  ;;  %v804_v12 = vadd.f32 %v796_v3, %v766_v9  ;;  %v816_v50 = vadd.f32 %v808_v63, %v1526_v45  ;;  %v1418_v9 = vmov 0.0  }
  0xba   :  { %v811_v48 = vadd.f32 %v803_v10, %v1510_v5  ;;  %v812_v18 = vadd.f32 %v804_v12, %v1510_v5  ;;  %v730_v5 = vmul.f32 %v1508_v1, %v1489_v20  ;;  %v824_v51 = vmax.f32 %v816_v50, 0.0  ;;  %v1582_v12 = vld [vmem:[%s2108_s3 + $0x8] sm:$0xff] }
  0xbb   :  { %v749_v19 = vpop.permute.xlu1 %748 }
  0xbc   :  { %v763_v21 = vmul.f32 %v755_v56, %v749_v19  ;;  %v764_v22 = vmul.f32 %v756_v57, %v749_v19  ;;  %v819_v27 = vmax.f32 %v811_v48, 0.0  ;;  %v820_v28 = vmax.f32 %v812_v18, 0.0  ;;  %v1589_v19 = vld [vmem:[%s2108_s3] sm:$0xff] }
  0xbd   :  { %v768_v39 = vadd.f32 %v760_v11, %v730_v5  ;;  %v1614_v5 = vld [vmem:[%s2108_s3 + $0x20] sm:$0xff] }
  0xbe   :  { %v1550_v4 = vadd.f32 %v763_v21, %v1517_v15  ;;  %v1553_v31 = vadd.f32 %v764_v22, %v1520_v17  ;;  %v827_v32 = vadd.f32 %v820_v28, %v819_v27  ;;  %v761_v17 = vmul.f32 %v755_v56, %v1506_v0  ;;  %v1595_v27 = vld [vmem:[%s2108_s3 + $0x18] sm:$0xff] }
  0xbf   :  { %v61_v56 = vlaneseq }
  0xc0   :  { %828 = vadd.xlane.f32.xlu1 %v827_v32  ;;  %v769_v46 = vadd.f32 %v761_v17, %v731_v43  ;;  %v1602_v32 = vld [vmem:[%s2108_s3 + $0x28] sm:$0xff] }
  0xc1   :  { %v62_v58 = vshrl.u32 %v61_v56, 7  ;;  %v67_v2 = vand.u32 127, %v61_v56  ;;  %vm1686_vm8 = vcmp.lt.s32.totalorder %v61_v56, 192  ;;  %v1703_v56 = vld [vmem:[%s2109_s4 + $0x20] sm:$0xff] }
  0xc2   :  { %v807_v35 = vadd.f32 %v799_v47, %v769_v46  ;;  %v1636_v46 = vld [vmem:[%s2108_s3 + $0x38] sm:$0xff] }
  0xc3   :  { %v63_v62 = vadd.s32 8, %v62_v58  ;;  %v64_v41 = vadd.s32 16, %v62_v58  ;;  %vm68_vm1 = vcmp.eq.s32.totalorder %v62_v58, %v67_v2  ;;  %v65_v22 = vadd.s32 24, %v62_v58 }
  0xc4   :  { %v779_v37 = vpop.permute.xlu1 %778  ;;  %v815_v1 = vadd.f32 %v807_v35, %v1526_v45  ;;  %v1577_v10 = vsel %vm68_vm1, 1.0, %v1418_v9 }
  0xc5   :  { %v797_v40 = vmul.f32 %v1540_v60, %v779_v37  ;;  %v798_v15 = vmul.f32 %v1542_v61, %v779_v37  ;;  %vm69_vm2 = vcmp.eq.s32.totalorder %v63_v62, %v67_v2  ;;  %vm70_vm3 = vcmp.eq.s32.totalorder %v64_v41, %v67_v2 }
  0xc6   :  { %v823_v36 = vmax.f32 %v815_v1, 0.0  ;;  %v1584_v18 = vsel %vm69_vm2, 1.0, %v1418_v9  ;;  %v1597_v28 = vsel %vm70_vm3, 1.0, %v1418_v9  ;;  %vm71_vm5 = vcmp.eq.s32.totalorder %v65_v22, %v67_v2 }
  0xc7   :  { %v805_v13 = vadd.f32 %v797_v40, %v767_v38  ;;  %v806_v24 = vadd.f32 %v798_v15, %v768_v39  ;;  %v1626_v23 = vsel %vm71_vm5, 1.0, %v1418_v9 }
  0xc8   :  { %v833_v52 = vadd.f32 %v824_v51, %v823_v36 }
  0xc9   :  { %v813_v20 = vadd.f32 %v805_v13, %v1484_v16  ;;  %v814_v25 = vadd.f32 %v806_v24, %v1484_v16  ;;  %v1417_v16 = vmov 256.0  }
  0xca   :  { %1353 = vrcp.f32 %v1417_v16 }
  0xcb   :  { %v821_v30 = vmax.f32 %v813_v20, 0.0  ;;  %v822_v49 = vmax.f32 %v814_v25, 0.0  ;;  %v1631_v25 = vld [vmem:[%s2108_s3 + $0x30] sm:$0xff] }
  0xcd   :  { %v830_v0 = vadd.f32 %v822_v49, %v821_v30 }
  0xcf   :  { %831 = vadd.xlane.f32.xlu2 %v830_v0 }
  0xd0   :  { %v1354_v53 = vpop.eup %1353 }
  0xd1   :  { %v233_v54 = vmul.f32 256.0, %v1354_v53  ;;  %vm237_vm0 = vweird.f32 %v1354_v53 }
  0xd3   :  { %v234_v55 = vsub.f32 1.0, %v233_v54 }
  0xd5   :  { %v235_v57 = vmul.f32 %v1354_v53, %v234_v55 }
  0xd7   :  { %v236_v59 = vadd.f32 %v1354_v53, %v235_v57 }
  0xd9   :  { %v1573_v3 = vsel %vm237_vm0, %v1354_v53, %v236_v59 }
  0xdd   :  { %834 = vadd.xlane.f32.xlu0 %v833_v52 }
 0x10d   :  { %v225_v6 = vpop.xlane.xlu1 %224 }
 0x10e   :  { %v240_v8 = vmul.f32 %v1573_v3, %v225_v6 }
 0x110   :  { %v244_v37 = vmul.f32 %v240_v8, %v1584_v18  ;;  %v264_v39 = vmul.f32 %v240_v8, %v1595_v27  ;;  %v263_v17 = vmul.f32 %v240_v8, %v1607_v33 }
 0x112   :  { %v222_v45 = vpop.xlane.xlu0 %221  ;;  %v249_v13 = vsel %vm247_vm4, %v244_v37, 0.0  ;;  %v280_v29 = vsel %vm278_vm6, %v264_v39, 0.0 }
 0x113   :  { %v239_v7 = vmul.f32 %v1573_v3, %v222_v45 }
 0x115   :  { %v243_v11 = vmul.f32 %v239_v7, %v1577_v10  ;;  %v262_v34 = vmul.f32 %v239_v7, %v1582_v12  ;;  %v261_v38 = vmul.f32 %v239_v7, %v1589_v19 }
 0x117   :  { %v248_v43 = vsel %vm247_vm4, %v243_v11, 0.0  ;;  %v279_v44 = vsel %vm278_vm6, %v262_v34, 0.0  ;;  %v269_v24 = vadd.f32 %v263_v17, %v261_v38 }
 0x118   :  { %v250_v49 = vadd.f32 %v249_v13, %v248_v43  ;;  %v281_v0 = vadd.f32 %v280_v29, %v279_v44  ;;  %v1663_v44 = vld [vmem:[%s2109_s4 + $0x10] sm:$0xff]  ;;  %v1668_v13 = vld [vmem:[%s2109_s4 + $0x8] sm:$0xff] }
 0x11b   :  { %v228_v48 = vpop.xlane.xlu2 %227 }
 0x11c   :  { %v241_v21 = vmul.f32 %v1573_v3, %v228_v48 }
 0x11e   :  { %v245_v40 = vmul.f32 %v241_v21, %v1597_v28  ;;  %v266_v15 = vmul.f32 %v241_v21, %v1602_v32  ;;  %v265_v42 = vmul.f32 %v241_v21, %v1614_v5 }
 0x120   :  { %v251_v47 = vsel %vm247_vm4, %v245_v40, 0.0  ;;  %v282_v14 = vsel %vm278_vm6, %v266_v15, 0.0  ;;  %v270_v35 = vadd.f32 %v269_v24, %v265_v42  ;;  %v1673_v24 = vld [vmem:[%s2109_s4] sm:$0xff] }
 0x121   :  { %v252_v52 = vadd.f32 %v251_v47, %v250_v49  ;;  %v283_v16 = vadd.f32 %v282_v14, %v281_v0 }
 0x123   :  { %v231_v20 = vpop.xlane.xlu2 %230 }
 0x124   :  { %v242_v30 = vmul.f32 %v1573_v3, %v231_v20 }
 0x125   :  { %v787_v63 = vpop.permute.xlu0 %786 }
 0x126   :  { %v246_v1 = vmul.f32 %v242_v30, %v1626_v23  ;;  %v267_v50 = vmul.f32 %v242_v30, %v1631_v25  ;;  %v268_v36 = vmul.f32 %v242_v30, %v1636_v46  ;;  %v801_v51 = vmul.f32 %v1540_v60, %v787_v63 }
 0x127   :  { %v802_v53 = vmul.f32 %v1542_v61, %v787_v63 }
 0x128   :  { %v253_v54 = vsel %vm247_vm4, %v246_v1, 0.0  ;;  %v271_v55 = vadd.f32 %v270_v35, %v267_v50  ;;  %v284_v57 = vsel %vm278_vm6, %v268_v36, 0.0  ;;  %v809_v58 = vadd.f32 %v801_v51, %v1550_v4  ;;  %v1698_v51 = vld [vmem:[%s2109_s4 + $0x28] sm:$0xff] }
 0x129   :  { %v254_v59 = vadd.f32 %v253_v54, %v252_v52  ;;  %v285_v62 = vadd.f32 %v284_v57, %v283_v16  ;;  %v810_v2 = vadd.f32 %v802_v53, %v1553_v31  ;;  %v1656_v31 = vld [vmem:[%s2108_s3 + $0x40] ss:$8 sm:$0x3]  ;;  %v1709_v53 = vld [vmem:[%s2109_s4 + $0x18] sm:$0xff] }
 0x12a   :  { %v272_v41 = vrot.slane %v271_v55, 4  ;;  %v817_v45 = vadd.f32 %v809_v58, %v1491_v26  ;;  %v294_v17 = vperm.slane %v1656_v31, 1  ;;  %v293_v43 = vperm.slane %v1656_v31, 0 }
 0x12b   :  { %v255_v6 = vrot.slane %v254_v59, 4  ;;  %v286_v60 = vrot.slane %v285_v62, 4  ;;  %v818_v7 = vadd.f32 %v810_v2, %v1491_v26  ;;  %v1728_v2 = vld [vmem:[%s2109_s4 + $0x40] sm:$0xff] }
 0x12c   :  { %v273_v8 = vadd.f32 %v272_v41, %v271_v55  ;;  %v825_v61 = vmax.f32 %v817_v45, 0.0 }
 0x12d   :  { %v256_v9 = vadd.f32 %v255_v6, %v254_v59  ;;  %v287_v48 = vadd.f32 %v286_v60, %v285_v62  ;;  %v826_v21 = vmax.f32 %v818_v7, 0.0  ;;  %v1735_v60 = vld [vmem:[%s2109_s4 + $0x38] sm:$0xff] }
 0x12e   :  { %v274_v22 = vrot.slane %v273_v8, 2 }
 0x12f   :  { %v257_v11 = vrot.slane %v256_v9, 2  ;;  %v288_v34 = vrot.slane %v287_v48, 2  ;;  %v836_v4 = vadd.f32 %v826_v21, %v825_v61  ;;  %v1742_v61 = vld [vmem:[%s2109_s4 + $0x30] sm:$0xff] }
 0x130   :  { %v275_v37 = vadd.f32 %v274_v22, %v273_v8 }
 0x131   :  { %v258_v38 = vadd.f32 %v257_v11, %v256_v9  ;;  %v289_v39 = vadd.f32 %v288_v34, %v287_v48  ;;  %837 = vadd.xlane.f32.xlu1 %v836_v4 }
 0x132   :  { %v276_v40 = vrot.slane %v275_v37, 1 }
 0x133   :  { %v259_v26 = vrot.slane %v258_v38, 1  ;;  %v290_v15 = vrot.slane %v289_v39, 1  ;;  %v829_v16 = vpop.xlane.xlu1 %828 }
 0x134   :  { %v277_v42 = vadd.f32 %v276_v40, %v275_v37  ;;  %v839_v57 = vmul.f32 %v829_v16, %v1573_v3 }
 0x135   :  { %v1675_v20 = vadd.f32 %v259_v26, %v258_v38  ;;  %v291_v29 = vadd.f32 %v290_v15, %v289_v39  ;;  %v1764_v26 = vld [vmem:[%s2109_s4 + $0x58] sm:$0xff]  ;;  %v1769_v15 = vld [vmem:[%s2109_s4 + $0x50] sm:$0xff] }
 0x136   :  { %v297_v35 = vadd.f32 %v293_v43, %v277_v42  ;;  %v843_v41 = vmul.f32 %v839_v57, %v1577_v10  ;;  %v861_v7 = vmul.f32 %v839_v57, %v1582_v12  ;;  %v860_v10 = vmul.f32 %v839_v57, %v1589_v19  ;;  %v1774_v42 = vld [vmem:[%s2109_s4 + $0x48] sm:$0xff] }
 0x137   :  { %v298_v47 = vadd.f32 %v294_v17, %v291_v29  ;;  %v312_v14 = vmul.f32 %v1675_v20, %v1663_v44  ;;  %v311_v30 = vmul.f32 %v1675_v20, %v1668_v13  ;;  %v310_v49 = vmul.f32 %v1675_v20, %v1673_v24 }
 0x138   :  { %v315_v54 = vmul.f32 %v1675_v20, %v1698_v51  ;;  %v314_v55 = vmul.f32 %v1675_v20, %v1703_v56  ;;  %v313_v58 = vmul.f32 %v1675_v20, %v1709_v53  ;;  %v318_v9 = vmul.f32 %v1675_v20, %v1728_v2 }
 0x139   :  { %v301_v63 = vrot.slane %v298_v47, 7  ;;  %v340_v1 = vsel %vm247_vm4, %v312_v14, 0.0  ;;  %v337_v50 = vsel %vm247_vm4, %v311_v30, 0.0  ;;  %v334_v36 = vsel %vm247_vm4, %v310_v49, 0.0 }
 0x13a   :  { %341 = vadd.xlane.f32.xlu2 %v340_v1  ;;  %338 = vadd.xlane.f32.xlu1 %v337_v50  ;;  %v349_v59 = vsel %vm247_vm4, %v315_v54, 0.0  ;;  %v346_v62 = vsel %vm247_vm4, %v314_v55, 0.0  ;;  %v343_v6 = vsel %vm247_vm4, %v313_v58, 0.0  ;;  %v317_v12 = vmul.f32 %v1675_v20, %v1735_v60  ;;  %v1788_v1 = vld [vmem:[%s2109_s4 + $0x70] sm:$0xff]  ;;  %v1802_v55 = vld [vmem:[%s2109_s4 + $0x60] sm:$0xff] }
 0x13b   :  { %v303_v52 = vsel %vm302_vm7, %v297_v35, %v301_v63  ;;  %335 = vadd.xlane.f32.xlu0 %v334_v36  ;;  %v847_v11 = vsel %vm247_vm4, %v843_v41, 0.0  ;;  %v316_v34 = vmul.f32 %v1675_v20, %v1742_v61  ;;  %v877_v4 = vsel %vm278_vm6, %v861_v7, 0.0  ;;  %v1794_v36 = vld [vmem:[%s2109_s4 + $0x68] sm:$0xff] }
 0x13c   :  { %309 = vst.msk [vmem:[%s2110_s5] sm:$0x3] %vm1686_vm8, %v303_v52  ;;  %v321_v29 = vmul.f32 %v1675_v20, %v1764_v26  ;;  %v320_v47 = vmul.f32 %v1675_v20, %v1769_v15  ;;  %v319_v14 = vmul.f32 %v1675_v20, %v1774_v42  ;;  %v324_v57 = vmul.f32 %v1675_v20, %v1788_v1 }
 0x13d   :  { %v352_v40 = vsel %vm247_vm4, %v316_v34, 0.0 }
 0x13e   :  { %v367_v35 = vsel %vm247_vm4, %v321_v29, 0.0  ;;  %v364_v63 = vsel %vm247_vm4, %v320_v47, 0.0  ;;  %v361_v50 = vsel %vm247_vm4, %v319_v14, 0.0  ;;  %v1866_v29 = vld [vmem:[%s2109_s4 + $0xb8] sm:$0xff]  ;;  %v1871_v47 = vld [vmem:[%s2109_s4 + $0xb0] sm:$0xff]  ;;  %v1876_v14 = vld [vmem:[%s2109_s4 + $0xa8] sm:$0xff] }
 0x142   :  { %v832_v45 = vpop.xlane.xlu2 %831  ;;  %350 = vadd.xlane.f32.xlu2 %v349_v59  ;;  %347 = vadd.xlane.f32.xlu1 %v346_v62 }
 0x143   :  { %v840_v8 = vmul.f32 %v832_v45, %v1573_v3  ;;  %344 = vadd.xlane.f32.xlu0 %v343_v6  ;;  %v376_v45 = vsel %vm247_vm4, %v324_v57, 0.0 }
 0x145   :  { %v844_v48 = vmul.f32 %v840_v8, %v1584_v18  ;;  %v862_v21 = vmul.f32 %v840_v8, %v1607_v33  ;;  %v863_v22 = vmul.f32 %v840_v8, %v1595_v27  ;;  %v358_v33 = vsel %vm247_vm4, %v318_v9, 0.0  ;;  %v1818_v8 = vld [vmem:[%s2109_s4 + $0x88] sm:$0xff]  ;;  %v1828_v9 = vld [vmem:[%s2109_s4 + $0x78] sm:$0xff] }
 0x146   :  { %v355_v27 = vsel %vm247_vm4, %v317_v12, 0.0 }
 0x147   :  { %v848_v19 = vsel %vm247_vm4, %v844_v48, 0.0  ;;  %v868_v37 = vadd.f32 %v862_v21, %v860_v10  ;;  %v878_v38 = vsel %vm278_vm6, %v863_v22, 0.0  ;;  %v1823_v10 = vld [vmem:[%s2109_s4 + $0x80] sm:$0xff]  ;;  %v327_v48 = vmul.f32 %v1675_v20, %v1818_v8 }
 0x148   :  { %v849_v18 = vadd.f32 %v848_v19, %v847_v11  ;;  %v879_v39 = vadd.f32 %v878_v38, %v877_v4  ;;  %v326_v21 = vmul.f32 %v1675_v20, %v1823_v10  ;;  %v325_v22 = vmul.f32 %v1675_v20, %v1828_v9  ;;  %v1842_v4 = vld [vmem:[%s2109_s4 + $0xa0] sm:$0xff]  ;;  %v1847_v19 = vld [vmem:[%s2109_s4 + $0x98] sm:$0xff] }
 0x149   :  { %v385_v12 = vsel %vm247_vm4, %v327_v48, 0.0  ;;  %v330_v38 = vmul.f32 %v1675_v20, %v1842_v4 }
 0x14a   :  { %359 = vadd.xlane.f32.xlu2 %v358_v33  ;;  %356 = vadd.xlane.f32.xlu1 %v355_v27  ;;  %v382_v11 = vsel %vm247_vm4, %v326_v21, 0.0  ;;  %v379_v34 = vsel %vm247_vm4, %v325_v22, 0.0 }
 0x14b   :  { %353 = vadd.xlane.f32.xlu0 %v352_v40  ;;  %v394_v33 = vsel %vm247_vm4, %v330_v38, 0.0 }
 0x150   :  { %v835_v30 = vpop.xlane.xlu0 %834 }
 0x151   :  { %v841_v49 = vmul.f32 %v835_v30, %v1573_v3  ;;  %v333_v30 = vmul.f32 %v1675_v20, %v1866_v29 }
 0x152   :  { %368 = vadd.xlane.f32.xlu2 %v367_v35  ;;  %365 = vadd.xlane.f32.xlu1 %v364_v63  ;;  %v331_v35 = vmul.f32 %v1675_v20, %v1876_v14 }
 0x153   :  { %v845_v52 = vmul.f32 %v841_v49, %v1597_v28  ;;  %v864_v16 = vmul.f32 %v841_v49, %v1614_v5  ;;  %v865_v54 = vmul.f32 %v841_v49, %v1602_v32  ;;  %362 = vadd.xlane.f32.xlu0 %v361_v50  ;;  %v323_v28 = vmul.f32 %v1675_v20, %v1794_v36 }
 0x154   :  { %v322_v32 = vmul.f32 %v1675_v20, %v1802_v55  ;;  %v332_v49 = vmul.f32 %v1675_v20, %v1871_v47  ;;  %v403_v63 = vsel %vm247_vm4, %v333_v30, 0.0 }
 0x155   :  { %v850_v58 = vsel %vm247_vm4, %v845_v52, 0.0  ;;  %v869_v59 = vadd.f32 %v868_v37, %v864_v16  ;;  %v880_v62 = vsel %vm278_vm6, %v865_v54, 0.0  ;;  %v373_v6 = vsel %vm247_vm4, %v323_v28, 0.0  ;;  %v1852_v37 = vld [vmem:[%s2109_s4 + $0x90] sm:$0xff] }
 0x156   :  { %v851_v5 = vadd.f32 %v850_v58, %v849_v18  ;;  %v881_v41 = vadd.f32 %v880_v62, %v879_v39  ;;  %v370_v7 = vsel %vm247_vm4, %v322_v32, 0.0  ;;  %v329_v18 = vmul.f32 %v1675_v20, %v1847_v19 }
 0x157   :  { %v328_v39 = vmul.f32 %v1675_v20, %v1852_v37  ;;  %v400_v50 = vsel %vm247_vm4, %v332_v49, 0.0  ;;  %v397_v52 = vsel %vm247_vm4, %v331_v35, 0.0 }
 0x158   :  { %v391_v27 = vsel %vm247_vm4, %v329_v18, 0.0 }
 0x159   :  { %v388_v40 = vsel %vm247_vm4, %v328_v39, 0.0 }
 0x15a   :  { %377 = vadd.xlane.f32.xlu2 %v376_v45  ;;  %374 = vadd.xlane.f32.xlu1 %v373_v6 }
 0x15b   :  { %371 = vadd.xlane.f32.xlu0 %v370_v7 }
 0x162   :  { %386 = vadd.xlane.f32.xlu2 %v385_v12  ;;  %383 = vadd.xlane.f32.xlu1 %v382_v11 }
 0x163   :  { %380 = vadd.xlane.f32.xlu0 %v379_v34 }
 0x16a   :  { %395 = vadd.xlane.f32.xlu2 %v394_v33  ;;  %392 = vadd.xlane.f32.xlu1 %v391_v27 }
 0x16b   :  { %389 = vadd.xlane.f32.xlu0 %v388_v40 }
 0x172   :  { %404 = vadd.xlane.f32.xlu2 %v403_v63  ;;  %401 = vadd.xlane.f32.xlu1 %v400_v50 }
 0x173   :  { %398 = vadd.xlane.f32.xlu0 %v397_v52 }
 0x1a4   :  { %v838_v16 = vpop.xlane.xlu1 %837 }
 0x1a5   :  { %v842_v54 = vmul.f32 %v838_v16, %v1573_v3 }
 0x1a7   :  { %v846_v57 = vmul.f32 %v842_v54, %v1626_v23  ;;  %v866_v58 = vmul.f32 %v842_v54, %v1631_v25  ;;  %v867_v62 = vmul.f32 %v842_v54, %v1636_v46 }
 0x1a9   :  { %v852_v20 = vsel %vm247_vm4, %v846_v57, 0.0  ;;  %v870_v28 = vadd.f32 %v869_v59, %v866_v58  ;;  %v882_v32 = vsel %vm278_vm6, %v867_v62, 0.0 }
 0x1aa   :  { %v853_v45 = vadd.f32 %v852_v20, %v851_v5  ;;  %v883_v6 = vadd.f32 %v882_v32, %v881_v41 }
 0x1ab   :  { %v871_v7 = vrot.slane %v870_v28, 4 }
 0x1ac   :  { %v854_v48 = vrot.slane %v853_v45, 4  ;;  %v884_v21 = vrot.slane %v883_v6, 4 }
 0x1ad   :  { %v872_v22 = vadd.f32 %v871_v7, %v870_v28 }
 0x1ae   :  { %v855_v12 = vadd.f32 %v854_v48, %v853_v45  ;;  %v885_v11 = vadd.f32 %v884_v21, %v883_v6 }
 0x1af   :  { %v873_v3 = vrot.slane %v872_v22, 2 }
 0x1b0   :  { %v856_v34 = vrot.slane %v855_v12, 2  ;;  %v886_v23 = vrot.slane %v885_v11, 2 }
 0x1b1   :  { %v874_v38 = vadd.f32 %v873_v3, %v872_v22 }
 0x1b2   :  { %v857_v25 = vadd.f32 %v856_v34, %v855_v12  ;;  %v887_v18 = vadd.f32 %v886_v23, %v885_v11 }
 0x1b3   :  { %v875_v46 = vrot.slane %v874_v38, 1 }
 0x1b4   :  { %v858_v39 = vrot.slane %v857_v25, 1  ;;  %v888_v33 = vrot.slane %v887_v18, 1 }
 0x1b5   :  { %v876_v59 = vadd.f32 %v875_v46, %v874_v38  ;;  %v1419_v46 = vmov 32  }
 0x1b6   :  { %v1893_v27 = vadd.f32 %v858_v39, %v857_v25  ;;  %v889_v5 = vadd.f32 %v888_v33, %v887_v18  ;;  %1347 = vset.pattern.permute.xlu1 %v1419_v46  ;;  %1346 = vset.pattern.permute.xlu0 %v1419_v46 }
 0x1b7   :  { %v890_v35 = vadd.f32 %v876_v59, %v293_v43  ;;  %1348 = vset.pattern.permute.xlu2 %v1419_v46 }
 0x1b8   :  { %v891_v41 = vadd.f32 %v889_v5, %v294_v17  ;;  %v900_v40 = vmul.f32 %v1893_v27, %v1668_v13  ;;  %v899_v30 = vmul.f32 %v1893_v27, %v1673_v24  ;;  %v902_v49 = vmul.f32 %v1893_v27, %v1709_v53  ;;  %v342_v5 = vpop.xlane.xlu2 %341 }
 0x1b9   :  { %v903_v31 = vmul.f32 %v1893_v27, %v1703_v56  ;;  %v901_v43 = vmul.f32 %v1893_v27, %v1663_v44  ;;  %v905_v54 = vmul.f32 %v1893_v27, %v1742_v61  ;;  %v906_v62 = vmul.f32 %v1893_v27, %v1735_v60 }
 0x1ba   :  { %v894_v63 = vrot.slane %v891_v41, 7  ;;  %v926_v50 = vsel %vm247_vm4, %v900_v40, 0.0  ;;  %v923_v52 = vsel %vm247_vm4, %v899_v30, 0.0  ;;  %v932_v16 = vsel %vm247_vm4, %v902_v49, 0.0  ;;  %v339_v41 = vpop.xlane.xlu1 %338  ;;  %v336_v40 = vpop.xlane.xlu0 %335 }
 0x1bb   :  { %927 = vadd.xlane.f32.xlu1 %v926_v50  ;;  %924 = vadd.xlane.f32.xlu2 %v923_v52  ;;  %v935_v57 = vsel %vm247_vm4, %v903_v31, 0.0  ;;  %v929_v58 = vsel %vm247_vm4, %v901_v43, 0.0  ;;  %v941_v0 = vsel %vm247_vm4, %v905_v54, 0.0  ;;  %v904_v20 = vmul.f32 %v1893_v27, %v1698_v51 }
 0x1bc   :  { %v895_v17 = vsel %vm302_vm7, %v890_v35, %v894_v63  ;;  %933 = vadd.xlane.f32.xlu0 %v932_v16  ;;  %v908_v28 = vmul.f32 %v1893_v27, %v1774_v42  ;;  %v944_v32 = vsel %vm247_vm4, %v906_v62, 0.0  ;;  %v909_v7 = vmul.f32 %v1893_v27, %v1769_v15 }
 0x1bd   :  { %1313 = vst.msk [vmem:[%s2110_s5 + $0x2] sm:$0x3] %vm1686_vm8, %v895_v17  ;;  %v938_v45 = vsel %vm247_vm4, %v904_v20, 0.0  ;;  %v907_v48 = vmul.f32 %v1893_v27, %v1728_v2  ;;  %v911_v21 = vmul.f32 %v1893_v27, %v1802_v55  ;;  %v912_v3 = vmul.f32 %v1893_v27, %v1794_v36 }
 0x1be   :  { %v950_v6 = vsel %vm247_vm4, %v908_v28, 0.0  ;;  %v953_v22 = vsel %vm247_vm4, %v909_v7, 0.0  ;;  %v910_v34 = vmul.f32 %v1893_v27, %v1764_v26  ;;  %v914_v23 = vmul.f32 %v1893_v27, %v1828_v9 }
 0x1bf   :  { %v947_v12 = vsel %vm247_vm4, %v907_v48, 0.0  ;;  %v959_v11 = vsel %vm247_vm4, %v911_v21, 0.0  ;;  %v962_v38 = vsel %vm247_vm4, %v912_v3, 0.0  ;;  %v915_v39 = vmul.f32 %v1893_v27, %v1823_v10 }
 0x1c0   :  { %v956_v25 = vsel %vm247_vm4, %v910_v34, 0.0  ;;  %v968_v18 = vsel %vm247_vm4, %v914_v23, 0.0  ;;  %v913_v33 = vmul.f32 %v1893_v27, %v1788_v1  ;;  %v917_v59 = vmul.f32 %v1893_v27, %v1852_v37  ;;  %v351_v16 = vpop.xlane.xlu2 %350 }
 0x1c1   :  { %v971_v30 = vsel %vm247_vm4, %v915_v39, 0.0  ;;  %v918_v63 = vmul.f32 %v1893_v27, %v1847_v19  ;;  %v916_v50 = vmul.f32 %v1893_v27, %v1818_v8  ;;  %v920_v52 = vmul.f32 %v1893_v27, %v1876_v14 }
 0x1c2   :  { %v965_v49 = vsel %vm247_vm4, %v913_v33, 0.0  ;;  %v977_v35 = vsel %vm247_vm4, %v917_v59, 0.0  ;;  %v348_v17 = vpop.xlane.xlu1 %347  ;;  %v345_v54 = vpop.xlane.xlu0 %344  ;;  %v406_v48 = vadd.f32 %v336_v40, %v1673_v24 }
 0x1c3   :  { %936 = vadd.xlane.f32.xlu1 %v935_v57  ;;  %930 = vadd.xlane.f32.xlu2 %v929_v58  ;;  %v980_v31 = vsel %vm247_vm4, %v918_v63, 0.0  ;;  %v974_v43 = vsel %vm247_vm4, %v916_v50, 0.0  ;;  %v986_v57 = vsel %vm247_vm4, %v920_v52, 0.0  ;;  %v921_v58 = vmul.f32 %v1893_v27, %v1871_v47 }
 0x1c4   :  { %942 = vadd.xlane.f32.xlu0 %v941_v0  ;;  %v919_v0 = vmul.f32 %v1893_v27, %v1842_v4  ;;  %v410_v40 = vadd.f32 %v348_v17, %v1703_v56 }
 0x1c5   :  { %v989_v62 = vsel %vm247_vm4, %v921_v58, 0.0 }
 0x1c6   :  { %v983_v20 = vsel %vm247_vm4, %v919_v0, 0.0 }
 0x1c8   :  { %v360_v28 = vpop.xlane.xlu2 %359 }
 0x1c9   :  { %v414_v50 = vadd.f32 %v360_v28, %v1728_v2 }
 0x1cb   :  { %945 = vadd.xlane.f32.xlu1 %v944_v32  ;;  %939 = vadd.xlane.f32.xlu2 %v938_v45  ;;  %v357_v32 = vpop.xlane.xlu1 %356  ;;  %v354_v45 = vpop.xlane.xlu0 %353 }
 0x1cc   :  { %951 = vadd.xlane.f32.xlu0 %v950_v6  ;;  %v922_v6 = vmul.f32 %v1893_v27, %v1866_v29  ;;  %v412_v63 = vadd.f32 %v354_v45, %v1742_v61 }
 0x1ce   :  { %v992_v7 = vsel %vm247_vm4, %v922_v6, 0.0 }
 0x1d0   :  { %v369_v21 = vpop.xlane.xlu2 %368 }
 0x1d3   :  { %954 = vadd.xlane.f32.xlu1 %v953_v22  ;;  %948 = vadd.xlane.f32.xlu2 %v947_v12  ;;  %v366_v22 = vpop.xlane.xlu1 %365  ;;  %v363_v12 = vpop.xlane.xlu0 %362 }
 0x1d4   :  { %960 = vadd.xlane.f32.xlu0 %v959_v11  ;;  %v413_v11 = vadd.f32 %v357_v32, %v1735_v60  ;;  %v416_v27 = vadd.f32 %v366_v22, %v1769_v15 }
 0x1d8   :  { %v378_v3 = vpop.xlane.xlu2 %377 }
 0x1d9   :  { %v420_v28 = vadd.f32 %v378_v3, %v1788_v1 }
 0x1db   :  { %963 = vadd.xlane.f32.xlu1 %v962_v38  ;;  %957 = vadd.xlane.f32.xlu2 %v956_v25  ;;  %v375_v34 = vpop.xlane.xlu1 %374  ;;  %v372_v23 = vpop.xlane.xlu0 %371  ;;  %v407_v38 = vadd.f32 %v339_v41, %v1668_v13  ;;  %v408_v25 = vadd.f32 %v342_v5, %v1663_v44  ;;  %v411_v41 = vadd.f32 %v351_v16, %v1698_v51 }
 0x1dc   :  { %969 = vadd.xlane.f32.xlu0 %v968_v18  ;;  %v409_v18 = vadd.f32 %v345_v54, %v1709_v53  ;;  %v419_v59 = vadd.f32 %v375_v34, %v1794_v36  ;;  %v415_v16 = vadd.f32 %v363_v12, %v1774_v42  ;;  %v417_v54 = vadd.f32 %v369_v21, %v1764_v26 }
 0x1e0   :  { %v387_v46 = vpop.xlane.xlu2 %386 }
 0x1e1   :  { %v423_v21 = vadd.f32 %v387_v46, %v1818_v8 }
 0x1e3   :  { %972 = vadd.xlane.f32.xlu1 %v971_v30  ;;  %966 = vadd.xlane.f32.xlu2 %v965_v49  ;;  %v384_v39 = vpop.xlane.xlu1 %383  ;;  %v381_v33 = vpop.xlane.xlu0 %380 }
 0x1e4   :  { %978 = vadd.xlane.f32.xlu0 %v977_v35  ;;  %v422_v5 = vadd.f32 %v384_v39, %v1823_v10 }
 0x1e8   :  { %v396_v30 = vpop.xlane.xlu2 %395 }
 0x1e9   :  { %v426_v34 = vadd.f32 %v396_v30, %v1842_v4 }
 0x1eb   :  { %981 = vadd.xlane.f32.xlu1 %v980_v31  ;;  %975 = vadd.xlane.f32.xlu2 %v974_v43  ;;  %v393_v49 = vpop.xlane.xlu1 %392  ;;  %v390_v35 = vpop.xlane.xlu0 %389 }
 0x1ec   :  { %987 = vadd.xlane.f32.xlu0 %v986_v57  ;;  %v425_v52 = vadd.f32 %v393_v49, %v1847_v19  ;;  %v424_v3 = vadd.f32 %v390_v35, %v1852_v37 }
 0x1f0   :  { %v405_v31 = vpop.xlane.xlu2 %404 }
 0x1f3   :  { %990 = vadd.xlane.f32.xlu1 %v989_v62  ;;  %984 = vadd.xlane.f32.xlu2 %v983_v20  ;;  %v402_v17 = vpop.xlane.xlu1 %401  ;;  %v399_v43 = vpop.xlane.xlu0 %398  ;;  %v418_v20 = vadd.f32 %v372_v23, %v1802_v55 }
 0x1f4   :  { %v428_v57 = vadd.f32 %v402_v17, %v1871_v47 }
 0x1fb   :  { %993 = vadd.xlane.f32.xlu2 %v992_v7  ;;  %v421_v7 = vadd.f32 %v381_v33, %v1828_v9 }
 0x200   :  { %436 = vperm.xlu0 %1346, %v406_v48  }
 0x208   :  { %471 = vperm.xlu0 %1346, %v413_v11  }
 0x20c   :  { %441 = vperm.xlu1 %1347, %v407_v38  }
 0x210   :  { %494 = vperm.xlu0 %1346, %v416_v27  }
 0x213   :  { %446 = vperm.xlu2 %1348, %v408_v25   ;;  %v427_v25 = vadd.f32 %v399_v43, %v1876_v14 }
 0x214   :  { %451 = vperm.xlu1 %1347, %v409_v18   ;;  %v429_v18 = vadd.f32 %v405_v31, %v1866_v29 }
 0x218   :  { %509 = vperm.xlu0 %1346, %v419_v59  }
 0x21b   :  { %456 = vperm.xlu2 %1348, %v410_v40  }
 0x21c   :  { %461 = vperm.xlu1 %1347, %v411_v41  }
 0x220   :  { %540 = vperm.xlu0 %1346, %v422_v5  }
 0x223   :  { %466 = vperm.xlu2 %1348, %v412_v63  }
 0x224   :  { %484 = vperm.xlu1 %1347, %v414_v50  }
 0x228   :  { %555 = vperm.xlu0 %1346, %v425_v52  }
 0x22b   :  { %489 = vperm.xlu2 %1348, %v415_v16  }
 0x22c   :  { %499 = vperm.xlu1 %1347, %v417_v54  }
 0x22e   :  { %v928_v58 = vpop.xlane.xlu1 %927  ;;  %v925_v0 = vpop.xlane.xlu2 %924 }
 0x22f   :  { %v934_v62 = vpop.xlane.xlu0 %933  ;;  %v995_v32 = vadd.f32 %v925_v0, %v1673_v24  ;;  %v996_v40 = vadd.f32 %v928_v58, %v1668_v13 }
 0x230   :  { %570 = vperm.xlu0 %1346, %v428_v57   ;;  %v998_v5 = vadd.f32 %v934_v62, %v1709_v53 }
 0x233   :  { %504 = vperm.xlu2 %1348, %v418_v20  }
 0x234   :  { %514 = vperm.xlu1 %1347, %v420_v28  }
 0x236   :  { %v937_v45 = vpop.xlane.xlu1 %936  ;;  %v931_v6 = vpop.xlane.xlu2 %930 }
 0x237   :  { %v943_v48 = vpop.xlane.xlu0 %942  ;;  %v997_v59 = vadd.f32 %v931_v6, %v1663_v44  ;;  %v999_v35 = vadd.f32 %v937_v45, %v1703_v56 }
 0x238   :  { %1026 = vperm.xlu0 %1346, %v995_v32   ;;  %v1001_v13 = vadd.f32 %v943_v48, %v1742_v61  ;;  %v1350_v48 = vld [vmem:[%s2106_s1 + $0x1] ss:$0 sm:$0xff] }
 0x23b   :  { %519 = vperm.xlu2 %1348, %v421_v7  }
 0x23c   :  { %545 = vperm.xlu1 %1347, %v423_v21  }
 0x23e   :  { %v946_v22 = vpop.xlane.xlu1 %945  ;;  %v940_v12 = vpop.xlane.xlu2 %939 }
 0x23f   :  { %v1002_v11 = vadd.f32 %v946_v22, %v1735_v60  ;;  %v952_v24 = vpop.xlane.xlu0 %951  ;;  %v1000_v52 = vadd.f32 %v940_v12, %v1698_v51 }
 0x240   :  { %v1004_v53 = vadd.f32 %v952_v24, %v1774_v42 }
 0x241   :  { %1061 = vperm.xlu0 %1346, %v1002_v11  }
 0x243   :  { %550 = vperm.xlu2 %1348, %v424_v3  }
 0x244   :  { %560 = vperm.xlu1 %1347, %v426_v34  }
 0x246   :  { %v955_v23 = vpop.xlane.xlu1 %954  ;;  %v949_v38 = vpop.xlane.xlu2 %948 }
 0x247   :  { %v1005_v27 = vadd.f32 %v955_v23, %v1769_v15  ;;  %v961_v60 = vpop.xlane.xlu0 %960  ;;  %v1003_v17 = vadd.f32 %v949_v38, %v1728_v2 }
 0x248   :  { %v1007_v61 = vadd.f32 %v961_v60, %v1802_v55 }
 0x249   :  { %1084 = vperm.xlu0 %1346, %v1005_v27  }
 0x24b   :  { %565 = vperm.xlu2 %1348, %v427_v25  }
 0x24c   :  { %575 = vperm.xlu1 %1347, %v429_v18  }
 0x24e   :  { %v964_v46 = vpop.xlane.xlu1 %963  ;;  %v958_v39 = vpop.xlane.xlu2 %957 }
 0x24f   :  { %v1008_v33 = vadd.f32 %v964_v46, %v1794_v36  ;;  %v970_v30 = vpop.xlane.xlu0 %969  ;;  %v1006_v16 = vadd.f32 %v958_v39, %v1764_v26 }
 0x250   :  { %v1010_v57 = vadd.f32 %v970_v30, %v1828_v9 }
 0x251   :  { %1099 = vperm.xlu0 %1346, %v1008_v33  }
 0x253   :  { %1036 = vperm.xlu2 %1348, %v997_v59  }
 0x254   :  { %1031 = vperm.xlu1 %1347, %v996_v40  }
 0x256   :  { %v973_v15 = vpop.xlane.xlu1 %972  ;;  %v967_v41 = vpop.xlane.xlu2 %966 }
 0x257   :  { %v1011_v49 = vadd.f32 %v973_v15, %v1823_v10  ;;  %v979_v50 = vpop.xlane.xlu0 %978 }
 0x258   :  { %v1013_v0 = vadd.f32 %v979_v50, %v1852_v37 }
 0x259   :  { %1130 = vperm.xlu0 %1346, %v1011_v49  }
 0x25b   :  { %1046 = vperm.xlu2 %1348, %v999_v35  }
 0x25c   :  { %1041 = vperm.xlu1 %1347, %v998_v5  }
 0x25e   :  { %v982_v36 = vpop.xlane.xlu1 %981  ;;  %v976_v63 = vpop.xlane.xlu2 %975 }
 0x25f   :  { %v1014_v44 = vadd.f32 %v982_v36, %v1847_v19  ;;  %v988_v43 = vpop.xlane.xlu0 %987  ;;  %v1012_v55 = vadd.f32 %v976_v63, %v1818_v8 }
 0x260   :  { %v1016_v9 = vadd.f32 %v988_v43, %v1876_v14 }
 0x261   :  { %1145 = vperm.xlu0 %1346, %v1014_v44  }
 0x263   :  { %1056 = vperm.xlu2 %1348, %v1001_v13  }
 0x264   :  { %1051 = vperm.xlu1 %1347, %v1000_v52  }
 0x266   :  { %v991_v10 = vpop.xlane.xlu1 %990  ;;  %v985_v31 = vpop.xlane.xlu2 %984 }
 0x267   :  { %v1017_v56 = vadd.f32 %v991_v10, %v1871_v47  ;;  %v1009_v47 = vadd.f32 %v967_v41, %v1788_v1  ;;  %v1015_v1 = vadd.f32 %v985_v31, %v1842_v4  ;;  %v1349_v4 = vld [vmem:[%s2106_s1] ss:$0 sm:$0xff] }
 0x269   :  { %1160 = vperm.xlu0 %1346, %v1017_v56  }
 0x26b   :  { %1079 = vperm.xlu2 %1348, %v1004_v53  }
 0x26c   :  { %1074 = vperm.xlu1 %1347, %v1003_v17  }
 0x26e   :  { %v994_v19 = vpop.xlane.xlu2 %993 }
 0x26f   :  { %v1018_v6 = vadd.f32 %v994_v19, %v1866_v29 }
 0x272   :  { %v437_v51 = vpop.permute.xlu0 %436 }
 0x273   :  { %1094 = vperm.xlu2 %1348, %v1007_v61   ;;  %v474_v60 = vmul.f32 %v1349_v4, %v437_v51 }
 0x274   :  { %1089 = vperm.xlu1 %1347, %v1006_v16  }
 0x276   :  { %v447_v54 = vpop.permute.xlu2 %446 }
 0x277   :  { %v476_v3 = vmul.f32 %v1349_v4, %v447_v54 }
 0x27a   :  { %v2020_v42 = vpop.permute.xlu0 %471 }
 0x27b   :  { %1109 = vperm.xlu2 %1348, %v1010_v57  }
 0x27c   :  { %1104 = vperm.xlu1 %1347, %v1009_v47  }
 0x27e   :  { %v442_v2 = vpop.permute.xlu1 %441  ;;  %v457_v58 = vpop.permute.xlu2 %456 }
 0x27f   :  { %v475_v33 = vmul.f32 %v1349_v4, %v442_v2  ;;  %v478_v10 = vmul.f32 %v1349_v4, %v457_v58 }
 0x282   :  { %v495_v20 = vpop.permute.xlu0 %494 }
 0x283   :  { %1140 = vperm.xlu2 %1348, %v1013_v0   ;;  %v524_v12 = vmul.f32 %v1350_v48, %v495_v20 }
 0x284   :  { %1135 = vperm.xlu1 %1347, %v1012_v55  }
 0x285   :  { %v532_v24 = vadd.f32 %v524_v12, %v476_v3 }
 0x286   :  { %v452_v26 = vpop.permute.xlu1 %451  ;;  %v2024_v62 = vpop.permute.xlu2 %466 }
 0x287   :  { %v477_v11 = vmul.f32 %v1349_v4, %v452_v26  ;;  %v480_v55 = vmul.f32 %v1349_v4, %v2024_v62 }
 0x28a   :  { %v510_v45 = vpop.permute.xlu0 %509 }
 0x28b   :  { %1155 = vperm.xlu2 %1348, %v1016_v9   ;;  %v527_v31 = vmul.f32 %v1350_v48, %v510_v45 }
 0x28c   :  { %1150 = vperm.xlu1 %1347, %v1015_v1   ;;  %v481_v1 = vmul.f32 %v1349_v4, %v2020_v42 }
 0x28e   :  { %v462_v28 = vpop.permute.xlu1 %461  ;;  %v490_v32 = vpop.permute.xlu2 %489 }
 0x28f   :  { %v523_v46 = vmul.f32 %v1350_v48, %v490_v32  ;;  %v479_v44 = vmul.f32 %v1349_v4, %v462_v28 }
 0x291   :  { %v531_v41 = vadd.f32 %v523_v46, %v475_v33  ;;  %v535_v19 = vadd.f32 %v527_v31, %v479_v44 }
 0x292   :  { %v541_v7 = vpop.permute.xlu0 %540 }
 0x294   :  { %1165 = vperm.xlu1 %1347, %v1018_v6  }
 0x296   :  { %v485_v37 = vpop.permute.xlu1 %484  ;;  %v505_v8 = vpop.permute.xlu2 %504 }
 0x297   :  { %v522_v27 = vmul.f32 %v1350_v48, %v485_v37  ;;  %v526_v13 = vmul.f32 %v1350_v48, %v505_v8 }
 0x299   :  { %v530_v59 = vadd.f32 %v522_v27, %v474_v60  ;;  %v534_v61 = vadd.f32 %v526_v13, %v478_v10 }
 0x29a   :  { %v556_v29 = vpop.permute.xlu0 %555 }
 0x29b   :  { %v578_v36 = vadd.f32 %v541_v7, %v530_v59 }
 0x29e   :  { %v500_v21 = vpop.permute.xlu1 %499  ;;  %v520_v22 = vpop.permute.xlu2 %519 }
 0x29f   :  { %v525_v14 = vmul.f32 %v1350_v48, %v500_v21  ;;  %v529_v26 = vmul.f32 %v1350_v48, %v520_v22 }
 0x2a1   :  { %v533_v34 = vadd.f32 %v525_v14, %v477_v11  ;;  %v537_v8 = vadd.f32 %v529_v26, %v481_v1 }
 0x2a2   :  { %v571_v35 = vpop.permute.xlu0 %570 }
 0x2a3   :  { %v581_v18 = vadd.f32 %v556_v29, %v533_v34 }
 0x2a6   :  { %v515_v23 = vpop.permute.xlu1 %514  ;;  %v551_v38 = vpop.permute.xlu2 %550 }
 0x2a7   :  { %v580_v25 = vadd.f32 %v551_v38, %v532_v24  ;;  %v528_v16 = vmul.f32 %v1350_v48, %v515_v23 }
 0x2a9   :  { %v613_v39 = vmin.f32 %v580_v25, %v581_v18  ;;  %v536_v28 = vadd.f32 %v528_v16, %v480_v55 }
 0x2aa   :  { %v2038_v58 = vpop.permute.xlu0 %1026 }
 0x2ab   :  { %v614_v40 = vrot.slane %v613_v39, 4  ;;  %v584_v48 = vadd.f32 %v571_v35, %v536_v28 }
 0x2ad   :  { %v615_v15 = vmin.f32 %v613_v39, %v614_v40 }
 0x2ae   :  { %v546_v30 = vpop.permute.xlu1 %545  ;;  %v566_v49 = vpop.permute.xlu2 %565 }
 0x2af   :  { %v616_v5 = vrot.slane %v615_v15, 2  ;;  %v579_v63 = vadd.f32 %v546_v30, %v531_v41  ;;  %v583_v2 = vadd.f32 %v566_v49, %v535_v19 }
 0x2b1   :  { %v617_v50 = vmin.f32 %v615_v15, %v616_v5  ;;  %v586_v52 = vmin.f32 %v578_v36, %v579_v63 }
 0x2b3   :  { %v618_v56 = vrot.slane %v617_v50, 1  ;;  %v587_v53 = vrot.slane %v586_v52, 4  ;;  %v2043_v3 = vpop.permute.xlu0 %1061 }
 0x2b5   :  { %v619_v17 = vmin.f32 %v617_v50, %v618_v56  ;;  %v588_v43 = vmin.f32 %v586_v52, %v587_v53 }
 0x2b6   :  { %v561_v51 = vpop.permute.xlu1 %560  ;;  %v2035_v54 = vpop.permute.xlu2 %1036 }
 0x2b7   :  { %v1309_v57 = vmul.f32 -1.442695, %v619_v17  ;;  %v589_v47 = vrot.slane %v588_v43, 2  ;;  %v582_v0 = vadd.f32 %v561_v51, %v534_v61 }
 0x2b9   :  { %1355 = vpow2.f32 %v1309_v57  ;;  %v590_v20 = vmin.f32 %v588_v43, %v589_v47  ;;  %v640_v9 = vmin.f32 %v582_v0, %v583_v2 }
 0x2bb   :  { %v591_v32 = vrot.slane %v590_v20, 1  ;;  %v641_v45 = vrot.slane %v640_v9, 4  ;;  %v2049_v15 = vpop.permute.xlu0 %1084 }
 0x2bd   :  { %v592_v6 = vmin.f32 %v590_v20, %v591_v32  ;;  %v642_v37 = vmin.f32 %v640_v9, %v641_v45 }
 0x2be   :  { %v576_v7 = vpop.permute.xlu1 %575  ;;  %v2041_v21 = vpop.permute.xlu2 %1046 }
 0x2bf   :  { %v1356_v14 = vpop.eup %1355  ;;  %v1308_v12 = vmul.f32 -1.442695, %v592_v6  ;;  %v643_v62 = vrot.slane %v642_v37, 2  ;;  %v585_v22 = vadd.f32 %v576_v7, %v537_v8 }
 0x2c0   :  { %v623_v11 = vadd.f32 1.0, %v1356_v14 }
 0x2c1   :  { %1357 = vpow2.f32 %v1308_v12  ;;  %v644_v34 = vmin.f32 %v642_v37, %v643_v62  ;;  %v667_v42 = vmin.f32 %v584_v48, %v585_v22 }
 0x2c2   :  { %1359 = vrcp.f32 %v623_v11  ;;  %v635_v30 = vand.u32 2147483648, %v623_v11  ;;  %v633_v35 = vand.u32 2147483647, %v623_v11  ;;  %vm629_vm10 = vweird.f32 %v623_v11 }
 0x2c3   :  { %v645_v4 = vrot.slane %v644_v34, 1  ;;  %v668_v29 = vrot.slane %v667_v42, 4  ;;  %v2055_v51 = vpop.permute.xlu0 %1099 }
 0x2c4   :  { %v636_v10 = vor.u32 1.1754944e-38, %v635_v30  ;;  %vm634_vm12 = vcmp.eq.f32.partialorder %v633_v35, 8.507059e+37 }
 0x2c5   :  { %v646_v24 = vmin.f32 %v644_v34, %v645_v4  ;;  %v669_v23 = vmin.f32 %v667_v42, %v668_v29  ;;  %v2071_v29 = vld [vmem:[%s2106_s1 + $0x2] ss:$0 sm:$0xff] }
 0x2c6   :  { %v2045_v38 = vpop.permute.xlu1 %1031  ;;  %v2047_v27 = vpop.permute.xlu2 %1056 }
 0x2c7   :  { %v1358_v25 = vpop.eup %1357  ;;  %v1310_v18 = vmul.f32 -1.442695, %v646_v24  ;;  %v670_v60 = vrot.slane %v669_v23, 2 }
 0x2c8   :  { %v1360_v46 = vpop.eup %1359  ;;  %v596_v39 = vadd.f32 1.0, %v1358_v25 }
 0x2c9   :  { %v625_v33 = vmul.f32 %v1360_v46, %v623_v11  ;;  %1361 = vpow2.f32 %v1310_v18  ;;  %v671_v59 = vmin.f32 %v669_v23, %v670_v60  ;;  %vm630_vm9 = vweird.f32 %v1360_v46  ;;  %v2066_v11 = vld [vmem:[%s2106_s1 + $0x3] ss:$0 sm:$0xff]  ;;  %s1420_s1 = smov [#allocation2]  }
 0x2ca   :  { %1363 = vrcp.f32 %v596_v39  ;;  %vm631_vm11 = vmor %vm629_vm10, %vm630_vm9  ;;  %v608_v19 = vand.u32 2147483648, %v596_v39  ;;  %v606_v16 = vand.u32 2147483647, %v596_v39  ;;  %vm602_vm14 = vweird.f32 %v596_v39  ;;  %s1291_s28 = sshll.u32 %s1420_s1, 4  ;;  %s1292_s28 = int_to_ptr.vmem [resolvable:$true] %s1291_s28 }
 0x2cb   :  { %v626_v40 = vsub.f32 1.0, %v625_v33  ;;  %v672_v41 = vrot.slane %v671_v59, 1  ;;  %v1131_v48 = vpop.permute.xlu0 %1130  ;;  %v1114_v23 = vmul.f32 %v2066_v11, %v2049_v15  ;;  %v1066_v60 = vmul.f32 %v2071_v29, %v2035_v54 }
 0x2cc   :  { %v609_v26 = vor.u32 1.1754944e-38, %v608_v19  ;;  %vm607_vm0 = vcmp.eq.f32.partialorder %v606_v16, 8.507059e+37 }
 0x2cd   :  { %v627_v49 = vmul.f32 %v1360_v46, %v626_v40  ;;  %v673_v5 = vmin.f32 %v671_v59, %v672_v41 }
 0x2ce   :  { %v2051_v36 = vpop.permute.xlu1 %1041  ;;  %v2053_v63 = vpop.permute.xlu2 %1079 }
 0x2cf   :  { %v1362_v44 = vpop.eup %1361  ;;  %v628_v13 = vadd.f32 %v1360_v46, %v627_v49  ;;  %v1311_v50 = vmul.f32 -1.442695, %v673_v5  ;;  %v1067_v33 = vmul.f32 %v2071_v29, %v2051_v36  ;;  %v1122_v49 = vadd.f32 %v1114_v23, %v1066_v60 }
 0x2d0   :  { %v1364_v52 = vpop.eup %1363  ;;  %v650_v31 = vadd.f32 1.0, %v1362_v44  ;;  %v1064_v36 = vmul.f32 %v2071_v29, %v2038_v58 }
 0x2d1   :  { %v632_v56 = vsel %vm631_vm11, %v1360_v46, %v628_v13  ;;  %v598_v53 = vmul.f32 %v1364_v52, %v596_v39  ;;  %1365 = vpow2.f32 %v1311_v50  ;;  %vm603_vm13 = vweird.f32 %v1364_v52 }
 0x2d2   :  { %v637_v17 = vsel %vm634_vm12, %v636_v10, %v632_v56  ;;  %1367 = vrcp.f32 %v650_v31  ;;  %vm604_vm15 = vmor %vm602_vm14, %vm603_vm13  ;;  %v662_v45 = vand.u32 2147483648, %v650_v31  ;;  %v660_v37 = vand.u32 2147483647, %v650_v31 }
 0x2d3   :  { %639 = vst [vmem:[#allocation2 + $0x1] sm:$0x1] %v637_v17  ;;  %v599_v43 = vsub.f32 1.0, %v598_v53  ;;  %vm656_vm2 = vweird.f32 %v650_v31  ;;  %v1146_v5 = vpop.permute.xlu0 %1145  ;;  %v1065_v53 = vmul.f32 %v2071_v29, %v2045_v38  ;;  %v1117_v38 = vmul.f32 %v2066_v11, %v2055_v51 }
 0x2d4   :  { %v663_v62 = vor.u32 1.1754944e-38, %v662_v45  ;;  %vm661_vm4 = vcmp.eq.f32.partialorder %v660_v37, 8.507059e+37 }
 0x2d5   :  { %v600_v61 = vmul.f32 %v1364_v52, %v599_v43 }
 0x2d6   :  { %v2057_v57 = vpop.permute.xlu1 %1051  ;;  %v2059_v47 = vpop.permute.xlu2 %1094 }
 0x2d7   :  { %v1366_v2 = vpop.eup %1365  ;;  %v601_v0 = vadd.f32 %v1364_v52, %v600_v61  ;;  %v1116_v58 = vmul.f32 %v2066_v11, %v2059_v47 }
 0x2d8   :  { %v1368_v55 = vpop.eup %1367  ;;  %v677_v20 = vadd.f32 1.0, %v1366_v2 }
 0x2d9   :  { %v605_v9 = vsel %vm604_vm15, %v1364_v52, %v601_v0  ;;  %v652_v1 = vmul.f32 %v1368_v55, %v650_v31  ;;  %vm657_vm1 = vweird.f32 %v1368_v55  ;;  %v1113_v31 = vmul.f32 %v2066_v11, %v2053_v63 }
 0x2da   :  { %v610_v28 = vsel %vm607_vm0, %v609_v26, %v605_v9  ;;  %1369 = vrcp.f32 %v677_v20  ;;  %vm658_vm3 = vmor %vm656_vm2, %vm657_vm1  ;;  %v689_v24 = vand.u32 2147483648, %v677_v20  ;;  %v687_v18 = vand.u32 2147483647, %v677_v20 }
 0x2db   :  { %612 = vst [vmem:[#allocation2] sm:$0x1] %v610_v28  ;;  %v653_v32 = vsub.f32 1.0, %v652_v1  ;;  %vm683_vm6 = vweird.f32 %v677_v20  ;;  %v1121_v61 = vadd.f32 %v1113_v31, %v1065_v53  ;;  %v1069_v26 = vmul.f32 %v2071_v29, %v2057_v57 }
 0x2dc   :  { %v690_v40 = vor.u32 1.1754944e-38, %v689_v24  ;;  %vm688_vm8 = vcmp.eq.f32.partialorder %v687_v18, 8.507059e+37  ;;  %v1068_v9 = vmul.f32 %v2071_v29, %v2041_v21 }
 0x2dd   :  { %v654_v6 = vmul.f32 %v1368_v55, %v653_v32  ;;  %v1125_v45 = vadd.f32 %v1117_v38, %v1069_v26 }
 0x2de   :  { %v1075_v8 = vpop.permute.xlu1 %1074  ;;  %v2061_v7 = vpop.permute.xlu2 %1109  ;;  %v1124_v37 = vadd.f32 %v1116_v58, %v1068_v9 }
 0x2df   :  { %v655_v14 = vadd.f32 %v1368_v55, %v654_v6  ;;  %v1112_v52 = vmul.f32 %v2066_v11, %v1075_v8  ;;  %v1119_v21 = vmul.f32 %v2066_v11, %v2061_v7 }
 0x2e0   :  { %v1370_v12 = vpop.eup %1369 }
 0x2e1   :  { %v659_v22 = vsel %vm658_vm3, %v1368_v55, %v655_v14  ;;  %v679_v34 = vmul.f32 %v1370_v12, %v677_v20  ;;  %vm684_vm5 = vweird.f32 %v1370_v12  ;;  %v1120_v17 = vadd.f32 %v1112_v52, %v1064_v36 }
 0x2e2   :  { %v664_v42 = vsel %vm661_vm4, %v663_v62, %v659_v22  ;;  %vm685_vm7 = vmor %vm683_vm6, %vm684_vm5  ;;  %v1070_v62 = vmul.f32 %v2071_v29, %v2047_v27 }
 0x2e3   :  { %666 = vst [vmem:[#allocation2 + $0x2] sm:$0x1] %v664_v42  ;;  %v680_v4 = vsub.f32 1.0, %v679_v34  ;;  %v1168_v0 = vadd.f32 %v1131_v48, %v1120_v17  ;;  %v1071_v34 = vmul.f32 %v2071_v29, %v2043_v3 }
 0x2e5   :  { %v681_v25 = vmul.f32 %v1370_v12, %v680_v4  ;;  %v1127_v60 = vadd.f32 %v1119_v21, %v1071_v34 }
 0x2e6   :  { %v1090_v46 = vpop.permute.xlu1 %1089  ;;  %v1141_v41 = vpop.permute.xlu2 %1140 }
 0x2e7   :  { %v682_v39 = vadd.f32 %v1370_v12, %v681_v25  ;;  %v1115_v59 = vmul.f32 %v2066_v11, %v1090_v46  ;;  %v1170_v44 = vadd.f32 %v1141_v41, %v1122_v49  ;;  %v1161_v46 = vpop.permute.xlu0 %1160 }
 0x2e9   :  { %v686_v30 = vsel %vm685_vm7, %v1370_v12, %v682_v39  ;;  %v1123_v15 = vadd.f32 %v1115_v59, %v1067_v33 }
 0x2ea   :  { %v691_v35 = vsel %vm688_vm8, %v690_v40, %v686_v30 }
 0x2eb   :  { %693 = vst [vmem:[#allocation2 + $0x3] sm:$0x1] %v691_v35  ;;  %v1171_v54 = vadd.f32 %v1146_v5, %v1123_v15 }
 0x2ed   :  { %v1204_v13 = vmin.f32 %v1170_v44, %v1171_v54 }
 0x2ee   :  { %v1105_v50 = vpop.permute.xlu1 %1104  ;;  %v1156_v32 = vpop.permute.xlu2 %1155 }
 0x2ef   :  { %v1205_v10 = vrot.slane %v1204_v13, 4  ;;  %v1118_v57 = vmul.f32 %v2066_v11, %v1105_v50  ;;  %v1173_v14 = vadd.f32 %v1156_v32, %v1125_v45 }
 0x2f1   :  { %v1206_v56 = vmin.f32 %v1204_v13, %v1205_v10  ;;  %v1126_v42 = vadd.f32 %v1118_v57, %v1070_v62 }
 0x2f3   :  { %v1207_v43 = vrot.slane %v1206_v56, 2  ;;  %v1174_v59 = vadd.f32 %v1161_v46, %v1126_v42 }
 0x2f5   :  { %v1208_v19 = vmin.f32 %v1206_v56, %v1207_v43 }
 0x2f6   :  { %v1136_v16 = vpop.permute.xlu1 %1135 }
 0x2f7   :  { %v1209_v2 = vrot.slane %v1208_v19, 1  ;;  %v1169_v55 = vadd.f32 %v1136_v16, %v1121_v61 }
 0x2f9   :  { %v1210_v20 = vmin.f32 %v1208_v19, %v1209_v2  ;;  %v1176_v63 = vmin.f32 %v1168_v0, %v1169_v55 }
 0x2fb   :  { %v1317_v1 = vmul.f32 -1.442695, %v1210_v20  ;;  %v1177_v28 = vrot.slane %v1176_v63, 4 }
 0x2fd   :  { %1371 = vpow2.f32 %v1317_v1  ;;  %v1178_v6 = vmin.f32 %v1176_v63, %v1177_v28 }
 0x2fe   :  { %v1151_v8 = vpop.permute.xlu1 %1150 }
 0x2ff   :  { %v1179_v47 = vrot.slane %v1178_v6, 2  ;;  %v1172_v12 = vadd.f32 %v1151_v8, %v1124_v37 }
 0x301   :  { %v1180_v51 = vmin.f32 %v1178_v6, %v1179_v47  ;;  %v1231_v48 = vmin.f32 %v1172_v12, %v1173_v14 }
 0x303   :  { %v1372_v22 = vpop.eup %1371  ;;  %v1181_v4 = vrot.slane %v1180_v51, 1  ;;  %v1232_v24 = vrot.slane %v1231_v48, 4 }
 0x304   :  { %v1214_v23 = vadd.f32 1.0, %v1372_v22 }
 0x305   :  { %v1182_v25 = vmin.f32 %v1180_v51, %v1181_v4  ;;  %v1233_v18 = vmin.f32 %v1231_v48, %v1232_v24 }
 0x306   :  { %1373 = vrcp.f32 %v1214_v23  ;;  %v1166_v39 = vpop.permute.xlu1 %1165  ;;  %v1224_v13 = vand.u32 2147483647, %v1214_v23  ;;  %v1226_v50 = vand.u32 2147483648, %v1214_v23  ;;  %vm1220_vm10 = vweird.f32 %v1214_v23 }
 0x307   :  { %v1316_v27 = vmul.f32 -1.442695, %v1182_v25  ;;  %v1234_v33 = vrot.slane %v1233_v18, 2  ;;  %v1175_v7 = vadd.f32 %v1166_v39, %v1127_v60 }
 0x308   :  { %v1227_v53 = vor.u32 1.1754944e-38, %v1226_v50  ;;  %vm1225_vm12 = vcmp.eq.f32.partialorder %v1224_v13, 8.507059e+37 }
 0x309   :  { %1375 = vpow2.f32 %v1316_v27  ;;  %v1235_v11 = vmin.f32 %v1233_v18, %v1234_v33  ;;  %v1258_v40 = vmin.f32 %v1174_v59, %v1175_v7 }
 0x30b   :  { %v1236_v41 = vrot.slane %v1235_v11, 1  ;;  %v1259_v30 = vrot.slane %v1258_v40, 4 }
 0x30c   :  { %v1374_v3 = vpop.eup %1373 }
 0x30d   :  { %v1216_v29 = vmul.f32 %v1374_v3, %v1214_v23  ;;  %v1237_v15 = vmin.f32 %v1235_v11, %v1236_v41  ;;  %v1260_v49 = vmin.f32 %v1258_v40, %v1259_v30  ;;  %vm1221_vm9 = vweird.f32 %v1374_v3 }
 0x30e   :  { %vm1222_vm11 = vmor %vm1220_vm10, %vm1221_vm9 }
 0x30f   :  { %v1376_v35 = vpop.eup %1375  ;;  %v1217_v5 = vsub.f32 1.0, %v1216_v29  ;;  %v1318_v44 = vmul.f32 -1.442695, %v1237_v15  ;;  %v1261_v54 = vrot.slane %v1260_v49, 2 }
 0x310   :  { %v1186_v52 = vadd.f32 1.0, %v1376_v35 }
 0x311   :  { %v1218_v10 = vmul.f32 %v1374_v3, %v1217_v5  ;;  %1377 = vpow2.f32 %v1318_v44  ;;  %v1262_v36 = vmin.f32 %v1260_v49, %v1261_v54 }
 0x312   :  { %1379 = vrcp.f32 %v1186_v52  ;;  %v1198_v58 = vand.u32 2147483648, %v1186_v52  ;;  %v1196_v63 = vand.u32 2147483647, %v1186_v52  ;;  %vm1192_vm14 = vweird.f32 %v1186_v52 }
 0x313   :  { %v1219_v31 = vadd.f32 %v1374_v3, %v1218_v10  ;;  %v1263_v56 = vrot.slane %v1262_v36, 1 }
 0x314   :  { %v1199_v28 = vor.u32 1.1754944e-38, %v1198_v58  ;;  %vm1197_vm0 = vcmp.eq.f32.partialorder %v1196_v63, 8.507059e+37 }
 0x315   :  { %v1223_v17 = vsel %vm1222_vm11, %v1374_v3, %v1219_v31  ;;  %v1264_v43 = vmin.f32 %v1262_v36, %v1263_v56 }
 0x316   :  { %v1228_v19 = vsel %vm1225_vm12, %v1227_v53, %v1223_v17 }
 0x317   :  { %v1378_v61 = vpop.eup %1377  ;;  %1230 = vst [vmem:[#allocation2 + $0x5] sm:$0x1] %v1228_v19  ;;  %v1319_v16 = vmul.f32 -1.442695, %v1264_v43 }
 0x318   :  { %v1380_v2 = vpop.eup %1379  ;;  %v1241_v0 = vadd.f32 1.0, %v1378_v61 }
 0x319   :  { %v1188_v55 = vmul.f32 %v1380_v2, %v1186_v52  ;;  %1381 = vpow2.f32 %v1319_v16  ;;  %vm1193_vm13 = vweird.f32 %v1380_v2 }
 0x31a   :  { %1383 = vrcp.f32 %v1241_v0  ;;  %vm1194_vm15 = vmor %vm1192_vm14, %vm1193_vm13  ;;  %v1253_v57 = vand.u32 2147483648, %v1241_v0  ;;  %v1251_v47 = vand.u32 2147483647, %v1241_v0  ;;  %vm1247_vm2 = vweird.f32 %v1241_v0 }
 0x31b   :  { %v1189_v26 = vsub.f32 1.0, %v1188_v55 }
 0x31c   :  { %v1254_v21 = vor.u32 1.1754944e-38, %v1253_v57  ;;  %vm1252_vm4 = vcmp.eq.f32.partialorder %v1251_v47, 8.507059e+37 }
 0x31d   :  { %v1190_v20 = vmul.f32 %v1380_v2, %v1189_v26 }
 0x31f   :  { %v1382_v9 = vpop.eup %1381  ;;  %v1191_v38 = vadd.f32 %v1380_v2, %v1190_v20 }
 0x320   :  { %v1384_v1 = vpop.eup %1383  ;;  %v1268_v32 = vadd.f32 1.0, %v1382_v9 }
 0x321   :  { %v1195_v45 = vsel %vm1194_vm15, %v1380_v2, %v1191_v38  ;;  %v1243_v6 = vmul.f32 %v1384_v1, %v1241_v0  ;;  %vm1248_vm1 = vweird.f32 %v1384_v1 }
 0x322   :  { %v1200_v37 = vsel %vm1197_vm0, %v1199_v28, %v1195_v45  ;;  %1385 = vrcp.f32 %v1268_v32  ;;  %vm1249_vm3 = vmor %vm1247_vm2, %vm1248_vm1  ;;  %v1280_v42 = vand.u32 2147483648, %v1268_v32  ;;  %v1278_v24 = vand.u32 2147483647, %v1268_v32 }
 0x323   :  { %1203 = vst [vmem:[#allocation2 + $0x4] sm:$0x1] %v1200_v37  ;;  %v1244_v8 = vsub.f32 1.0, %v1243_v6  ;;  %vm1274_vm6 = vweird.f32 %v1268_v32 }
 0x324   :  { %v1281_v25 = vor.u32 1.1754944e-38, %v1280_v42  ;;  %vm1279_vm8 = vcmp.eq.f32.partialorder %v1278_v24, 8.507059e+37 }
 0x325   :  { %v1245_v14 = vmul.f32 %v1384_v1, %v1244_v8 }
 0x327   :  { %v1246_v12 = vadd.f32 %v1384_v1, %v1245_v14 }
 0x328   :  { %v1386_v62 = vpop.eup %1385 }
 0x329   :  { %v1250_v51 = vsel %vm1249_vm3, %v1384_v1, %v1246_v12  ;;  %v1270_v48 = vmul.f32 %v1386_v62, %v1268_v32  ;;  %vm1275_vm5 = vweird.f32 %v1386_v62 }
 0x32a   :  { %v1255_v22 = vsel %vm1252_vm4, %v1254_v21, %v1250_v51  ;;  %vm1276_vm7 = vmor %vm1274_vm6, %vm1275_vm5 }
 0x32b   :  { %1257 = vst [vmem:[#allocation2 + $0x6] sm:$0x1] %v1255_v22  ;;  %v1271_v34 = vsub.f32 1.0, %v1270_v48 }
 0x32d   :  { %v1272_v4 = vmul.f32 %v1386_v62, %v1271_v34 }
 0x32f   :  { %v1273_v23 = vadd.f32 %v1386_v62, %v1272_v4 }
 0x331   :  { %v1277_v18 = vsel %vm1276_vm7, %v1386_v62, %v1273_v23 }
 0x332   :  { %v1282_v60 = vsel %vm1279_vm8, %v1281_v25, %v1277_v18 }
 0x333   :  { %1284 = vst [vmem:[#allocation2 + $0x7] sm:$0x1] %v1282_v60 }
 0x334   :  { %1299 = dma.vmem_to_hbm [thread:$0]  %s1292_s28, 128, %s1294_s30, [#allocation3], %s1421_s7, %s1421_s7, %s1422_s0  }
 0x335   :  { %1411 = dma.done.wait [#allocation3], 128  }
 0x336   :  { %1412 = vsyncadd [#allocation3], 4294967168 }
 0x337   :  { %1306 = vsyncpa [#allocation3], 1 }

</bundles_post_ra>
